<compile_context>
chip_gen: v7x
topology: tpu7x:2x2x1
jax: 0.10.0
libtpu: 0.0.40
codegen_flags: <defaults>
</compile_context>

<pallas_src>
import math

import jax
import jax.numpy as jnp
from jax.experimental import pallas as pl
from jax.experimental.pallas import tpu as pltpu

# ----------------------------- config ----------------------------------------
IMAGE_SIZE = 64          # small but /16-divisible (original docstring says 256)
PATCH = 16
IN_CH = 3
P_DIM = IN_CH * PATCH * PATCH      # 768 : Conv2d(3, D, 16, 16) folded to a matmul
D_MODEL = 32
N_HEAD = 4
DH = D_MODEL // N_HEAD
FF_DIM = 64
NUM_LAYERS = 2                     # config.ENCODER.NUM_LAYER
LN_EPS = 1e-5
SCALE = 1.0 / math.sqrt(DH)


# ----------------------------- fused kernel ----------------------------------
def _bf16(x):
    return x.astype(jnp.bfloat16)


def _layer_norm(z, g, b):
    # f32 elementwise (VPU/EUP math kept in f32 on every TPU generation)
    mu = jnp.mean(z, axis=-1, keepdims=True)
    zc = z - mu
    var = jnp.mean(zc * zc, axis=-1, keepdims=True)
    return zc * jax.lax.rsqrt(var + LN_EPS) * g + b


def _vit_encoder_kernel(
    patches_ref,                       # (1, L, P)  f32   -- one image per grid step
    ew_ref, eb_ref,                    # (P, D) bf16, (1, D) f32
    wqkv_ref, bqkv_ref,                # (NL, D, 3D) bf16, (NL, 1, 3D) f32
    wo_ref, bo_ref,                    # (NL, D, D) f32,  (NL, 1, D) f32
    ln1g_ref, ln1b_ref,                # (NL, 1, D) f32
    w1_ref, b1_ref,                    # (NL, D, FF) bf16, (NL, 1, FF) f32
    w2_ref, b2_ref,                    # (NL, FF, D) bf16, (NL, 1, D) f32
    ln2g_ref, ln2b_ref,                # (NL, 1, D) f32
    out_ref,                           # (1, L, D)  f32
):
    # ---- patch embedding (== Conv2d(3, D, 16, 16)) --------------------------
    x = jnp.dot(_bf16(patches_ref[0]), ew_ref[...],
                preferred_element_type=jnp.float32) + eb_ref[...]       # (L, D)

    for l in range(NUM_LAYERS):        # unrolled at trace time (NL == 2)
        # ---- fused QKV projection: one (L, D) x (D, 3D) matmul --------------
        qkv = jnp.dot(_bf16(x), wqkv_ref[l],
                      preferred_element_type=jnp.float32) + bqkv_ref[l]  # (L, 3D)
        q = qkv[:, 0:D_MODEL]
        k = qkv[:, D_MODEL:2 * D_MODEL]
        v = qkv[:, 2 * D_MODEL:3 * D_MODEL]

        # ---- per-head attention (tiny 16x16 scores; heads unrolled) ---------
        # out-projection is accumulated per head: sum_h (o_h @ Wo[h*DH:(h+1)*DH])
        wo_l = wo_ref[l]                                   # (D, D) f32
        attn_proj = None
        for h in range(N_HEAD):
            sl = slice(h * DH, (h + 1) * DH)
            qh = q[:, sl] * SCALE                          # (L, DH)
            kh = k[:, sl]
            vh = v[:, sl]
            s = jax.lax.dot_general(                       # (L, L) = qh @ kh^T
                qh, kh, (((1,), (1,)), ((), ())),
                preferred_element_type=jnp.float32)
            s = s - jnp.max(s, axis=-1, keepdims=True)
            p = jnp.exp(s)
            p = p * pl.reciprocal(jnp.sum(p, axis=-1, keepdims=True), approx=True)
            oh = jnp.dot(p, vh, preferred_element_type=jnp.float32)     # (L, DH)
            proj = jnp.dot(oh, wo_l[sl, :],                # (L, D)
                           preferred_element_type=jnp.float32)
            attn_proj = proj if attn_proj is None else attn_proj + proj
        attn_proj = attn_proj + bo_ref[l]

        # ---- residual + post-LN ---------------------------------------------
        x = _layer_norm(x + attn_proj, ln1g_ref[l], ln1b_ref[l])

        # ---- fused FFN: relu(x W1 + b1) W2 + b2, residual, post-LN ----------
        h1 = jnp.maximum(
            jnp.dot(_bf16(x), w1_ref[l],
                    preferred_element_type=jnp.float32) + b1_ref[l], 0.0)
        ff = jnp.dot(_bf16(h1), w2_ref[l],
                     preferred_element_type=jnp.float32) + b2_ref[l]
        x = _layer_norm(x + ff, ln2g_ref[l], ln2b_ref[l])

    out_ref[0] = x


def _const_index_map(ndim):
    zeros = (0,) * ndim

    def im(b):
        return zeros

    return im


# ----------------------------- forward wrapper -------------------------------
_WEIGHT_ORDER = (
    "embed_w", "embed_b",
    "wqkv", "bqkv", "wo", "bo", "ln1_g", "ln1_b",
    "w1", "b1", "w2", "b2", "ln2_g", "ln2_b",
)


@jax.jit
def transformer_v1_forward(images, params):
    B, C, H, W = images.shape
    hp, wp = H // PATCH, W // PATCH
    L = hp * wp

    # Patchify (pure layout glue; matches Conv2d(k=16, s=16) + permute + view).
    patches = images.reshape(B, C, hp, PATCH, wp, PATCH)
    patches = patches.transpose(0, 2, 4, 1, 3, 5).reshape(B, L, C * PATCH * PATCH)

    weight_args = tuple(params[name] for name in _WEIGHT_ORDER)

    seq_spec = pl.BlockSpec((1, L, P_DIM), lambda b: (b, 0, 0))
    out_spec = pl.BlockSpec((1, L, D_MODEL), lambda b: (b, 0, 0))
    weight_specs = [pl.BlockSpec(w.shape, _const_index_map(w.ndim))
                    for w in weight_args]

    return pl.pallas_call(
        _vit_encoder_kernel,
        out_shape=jax.ShapeDtypeStruct((B, L, D_MODEL), jnp.float32),
        grid_spec=pltpu.PrefetchScalarGridSpec(
            num_scalar_prefetch=0,
            grid=(B,),
            in_specs=[seq_spec] + weight_specs,
            out_specs=out_spec,
        ),
        compiler_params=pltpu.CompilerParams(
            dimension_semantics=("parallel",),   # batch-parallel -> v7x megacore
        ),
    )(patches, *weight_args)


# ----------------------------- pure-JAX reference ----------------------------
def _reference_forward(images, params):
    B, C, H, W = images.shape
    hp, wp = H // PATCH, W // PATCH
    L = hp * wp
    patches = images.reshape(B, C, hp, PATCH, wp, PATCH)
    patches = patches.transpose(0, 2, 4, 1, 3, 5).reshape(B, L, C * PATCH * PATCH)

    def ln(z, g, b):
        mu = z.mean(-1, keepdims=True)
        var = ((z - mu) ** 2).mean(-1, keepdims=True)
        return (z - mu) / jnp.sqrt(var + LN_EPS) * g + b

    f32 = lambda a: a.astype(jnp.float32)
    x = patches @ f32(params["embed_w"]) + params["embed_b"]
    for l in range(NUM_LAYERS):
        qkv = x @ f32(params["wqkv"][l]) + params["bqkv"][l]
        q, k, v = jnp.split(qkv, 3, axis=-1)
        q = q.reshape(B, L, N_HEAD, DH).transpose(0, 2, 1, 3)
        k = k.reshape(B, L, N_HEAD, DH).transpose(0, 2, 1, 3)
        v = v.reshape(B, L, N_HEAD, DH).transpose(0, 2, 1, 3)
        s = jnp.einsum("bhqd,bhkd->bhqk", q, k) * SCALE
        p = jax.nn.softmax(s, axis=-1)
        o = jnp.einsum("bhqk,bhkd->bhqd", p, v)
        o = o.transpose(0, 2, 1, 3).reshape(B, L, D_MODEL)
        o = o @ f32(params["wo"][l]) + params["bo"][l]
        x = ln(x + o, params["ln1_g"][l], params["ln1_b"][l])
        h1 = jnp.maximum(x @ f32(params["w1"][l]) + params["b1"][l], 0.0)
        ff = h1 @ f32(params["w2"][l]) + params["b2"][l]
        x = ln(x + ff, params["ln2_g"][l], params["ln2_b"][l])
    return x


# ----------------------------- parameter init --------------------------------
def init_params(key):
    ks = jax.random.split(key, 6)
    s = 0.02

    def nrm(k, shape):
        return s * jax.random.normal(k, shape, jnp.float32)

    return {
        # Conv2d(3, D, 16, 16) folded into a (768, D) patch matmul.
        "embed_w": nrm(ks[0], (P_DIM, D_MODEL)).astype(jnp.bfloat16),
        "embed_b": jnp.zeros((1, D_MODEL), jnp.float32),
        # Per-layer weights stacked along a leading NUM_LAYERS axis.
        "wqkv": nrm(ks[1], (NUM_LAYERS, D_MODEL, 3 * D_MODEL)).astype(jnp.bfloat16),
        "bqkv": jnp.zeros((NUM_LAYERS, 1, 3 * D_MODEL), jnp.float32),
        "wo": nrm(ks[2], (NUM_LAYERS, D_MODEL, D_MODEL)),          # f32 (sliced per head)
        "bo": jnp.zeros((NUM_LAYERS, 1, D_MODEL), jnp.float32),
        "ln1_g": jnp.ones((NUM_LAYERS, 1, D_MODEL), jnp.float32),
        "ln1_b": jnp.zeros((NUM_LAYERS, 1, D_MODEL), jnp.float32),
        "w1": nrm(ks[3], (NUM_LAYERS, D_MODEL, FF_DIM)).astype(jnp.bfloat16),
        "b1": jnp.zeros((NUM_LAYERS, 1, FF_DIM), jnp.float32),
        "w2": nrm(ks[4], (NUM_LAYERS, FF_DIM, D_MODEL)).astype(jnp.bfloat16),
        "b2": jnp.zeros((NUM_LAYERS, 1, D_MODEL), jnp.float32),
        "ln2_g": jnp.ones((NUM_LAYERS, 1, D_MODEL), jnp.float32),
        "ln2_b": jnp.zeros((NUM_LAYERS, 1, D_MODEL), jnp.float32),
    }


# ----------------------------- main -------------------------------------------
if __name__ == "__main__":
    key = jax.random.PRNGKey(0)
    k_img, k_par = jax.random.split(key)

    B = 2
    images = jax.random.normal(k_img, (B, IN_CH, IMAGE_SIZE, IMAGE_SIZE), jnp.float32)
    params = init_params(k_par)

    out = transformer_v1_forward(images, params)
    out = jax.block_until_ready(out)

    L = (IMAGE_SIZE // PATCH) ** 2
    assert out.shape == (B, L, D_MODEL)
    assert bool(jnp.all(jnp.isfinite(out)))

    ref = _reference_forward(images, params)
    max_err = float(jnp.max(jnp.abs(out - ref)))
    assert max_err < 0.1, f"max abs error vs f32 reference: {max_err}"

    print("KERNEL_OK")
</pallas_src>

<mosaic_0001>
module attributes {stable_mosaic.version = 11 : i64} {
  func.func @_vit_encoder_kernel(%arg0: i32, %arg1: memref<1x16x768xf32, #tpu.memory_space<vmem>>, %arg2: memref<768x32xbf16, #tpu.memory_space<vmem>>, %arg3: memref<1x32xf32, #tpu.memory_space<vmem>>, %arg4: memref<2x32x96xbf16, #tpu.memory_space<vmem>>, %arg5: memref<2x1x96xf32, #tpu.memory_space<vmem>>, %arg6: memref<2x32x32xf32, #tpu.memory_space<vmem>>, %arg7: memref<2x1x32xf32, #tpu.memory_space<vmem>>, %arg8: memref<2x1x32xf32, #tpu.memory_space<vmem>>, %arg9: memref<2x1x32xf32, #tpu.memory_space<vmem>>, %arg10: memref<2x32x64xbf16, #tpu.memory_space<vmem>>, %arg11: memref<2x1x64xf32, #tpu.memory_space<vmem>>, %arg12: memref<2x64x32xbf16, #tpu.memory_space<vmem>>, %arg13: memref<2x1x32xf32, #tpu.memory_space<vmem>>, %arg14: memref<2x1x32xf32, #tpu.memory_space<vmem>>, %arg15: memref<2x1x32xf32, #tpu.memory_space<vmem>>, %arg16: memref<1x16x32xf32, #tpu.memory_space<vmem>>) attributes {dimension_semantics = [#tpu.dimension_semantics<parallel>], iteration_bounds = array<i64: 2>, scalar_prefetch = 0 : i64, scratch_operands = 0 : i64, tpu.core_type = #tpu.core_type<tc>, window_params = [{transform_indices = @transform_0, window_bounds = array<i64: 1, 16, 768>}, {pipeline_mode = #tpu.pipeline_mode<synchronous>, transform_indices = @transform_1, window_bounds = array<i64: 768, 32>}, {pipeline_mode = #tpu.pipeline_mode<synchronous>, transform_indices = @transform_2, window_bounds = array<i64: 1, 32>}, {pipeline_mode = #tpu.pipeline_mode<synchronous>, transform_indices = @transform_3, window_bounds = array<i64: 2, 32, 96>}, {pipeline_mode = #tpu.pipeline_mode<synchronous>, transform_indices = @transform_4, window_bounds = array<i64: 2, 1, 96>}, {pipeline_mode = #tpu.pipeline_mode<synchronous>, transform_indices = @transform_5, window_bounds = array<i64: 2, 32, 32>}, {pipeline_mode = #tpu.pipeline_mode<synchronous>, transform_indices = @transform_6, window_bounds = array<i64: 2, 1, 32>}, {pipeline_mode = #tpu.pipeline_mode<synchronous>, transform_indices = @transform_7, window_bounds = array<i64: 2, 1, 32>}, {pipeline_mode = #tpu.pipeline_mode<synchronous>, transform_indices = @transform_8, window_bounds = array<i64: 2, 1, 32>}, {pipeline_mode = #tpu.pipeline_mode<synchronous>, transform_indices = @transform_9, window_bounds = array<i64: 2, 32, 64>}, {pipeline_mode = #tpu.pipeline_mode<synchronous>, transform_indices = @transform_10, window_bounds = array<i64: 2, 1, 64>}, {pipeline_mode = #tpu.pipeline_mode<synchronous>, transform_indices = @transform_11, window_bounds = array<i64: 2, 64, 32>}, {pipeline_mode = #tpu.pipeline_mode<synchronous>, transform_indices = @transform_12, window_bounds = array<i64: 2, 1, 32>}, {pipeline_mode = #tpu.pipeline_mode<synchronous>, transform_indices = @transform_13, window_bounds = array<i64: 2, 1, 32>}, {pipeline_mode = #tpu.pipeline_mode<synchronous>, transform_indices = @transform_14, window_bounds = array<i64: 2, 1, 32>}, {transform_indices = @transform_15, window_bounds = array<i64: 1, 16, 32>}]} {
    %c0 = arith.constant 0 : index
    %c0_0 = arith.constant 0 : index
    %c0_1 = arith.constant 0 : index
    %0 = vector.load %arg1[%c0, %c0_0, %c0_1] : memref<1x16x768xf32, #tpu.memory_space<vmem>>, vector<1x16x768xf32>
    %1 = vector.shape_cast %0 : vector<1x16x768xf32> to vector<16x768xf32>
    %2 = arith.truncf %1 : vector<16x768xf32> to vector<16x768xbf16>
    %c0_2 = arith.constant 0 : index
    %c0_3 = arith.constant 0 : index
    %3 = vector.load %arg2[%c0_2, %c0_3] : memref<768x32xbf16, #tpu.memory_space<vmem>>, vector<768x32xbf16>
    %cst = arith.constant dense<0.000000e+00> : vector<16x32xf32>
    %4 = tpu.matmul %2, %3, %cst {dimension_numbers = #tpu.dot_dimension_numbers<[1], [0], [0], [1], [0, 0, 1, 1], [], []>} : vector<16x768xbf16>, vector<768x32xbf16>, vector<16x32xf32> -> vector<16x32xf32>
    %c0_4 = arith.constant 0 : index
    %c0_5 = arith.constant 0 : index
    %5 = vector.load %arg3[%c0_4, %c0_5] : memref<1x32xf32, #tpu.memory_space<vmem>>, vector<1x32xf32>
    %6 = vector.broadcast %5 : vector<1x32xf32> to vector<16x32xf32>
    %7 = arith.addf %4, %6 : vector<16x32xf32>
    %8 = arith.truncf %7 : vector<16x32xf32> to vector<16x32xbf16>
    %c0_6 = arith.constant 0 : index
    %c0_7 = arith.constant 0 : index
    %c0_8 = arith.constant 0 : index
    %9 = vector.load %arg4[%c0_6, %c0_7, %c0_8] : memref<2x32x96xbf16, #tpu.memory_space<vmem>>, vector<1x32x96xbf16>
    %10 = vector.shape_cast %9 : vector<1x32x96xbf16> to vector<32x96xbf16>
    %cst_9 = arith.constant dense<0.000000e+00> : vector<16x96xf32>
    %11 = tpu.matmul %8, %10, %cst_9 {dimension_numbers = #tpu.dot_dimension_numbers<[1], [0], [0], [1], [0, 0, 1, 1], [], []>} : vector<16x32xbf16>, vector<32x96xbf16>, vector<16x96xf32> -> vector<16x96xf32>
    %c0_10 = arith.constant 0 : index
    %c0_11 = arith.constant 0 : index
    %c0_12 = arith.constant 0 : index
    %12 = vector.load %arg5[%c0_10, %c0_11, %c0_12] : memref<2x1x96xf32, #tpu.memory_space<vmem>>, vector<1x1x96xf32>
    %13 = vector.shape_cast %12 : vector<1x1x96xf32> to vector<1x96xf32>
    %14 = vector.broadcast %13 : vector<1x96xf32> to vector<16x96xf32>
    %15 = arith.addf %11, %14 : vector<16x96xf32>
    %16 = vector.extract_strided_slice %15 {offsets = [0, 0], sizes = [16, 32], strides = [1, 1]} : vector<16x96xf32> to vector<16x32xf32>
    %17 = vector.extract_strided_slice %15 {offsets = [0, 32], sizes = [16, 32], strides = [1, 1]} : vector<16x96xf32> to vector<16x32xf32>
    %18 = vector.extract_strided_slice %15 {offsets = [0, 64], sizes = [16, 32], strides = [1, 1]} : vector<16x96xf32> to vector<16x32xf32>
    %c0_13 = arith.constant 0 : index
    %c0_14 = arith.constant 0 : index
    %c0_15 = arith.constant 0 : index
    %19 = vector.load %arg6[%c0_13, %c0_14, %c0_15] : memref<2x32x32xf32, #tpu.memory_space<vmem>>, vector<1x32x32xf32>
    %20 = vector.shape_cast %19 : vector<1x32x32xf32> to vector<32x32xf32>
    %21 = vector.extract_strided_slice %16 {offsets = [0, 0], sizes = [16, 8], strides = [1, 1]} : vector<16x32xf32> to vector<16x8xf32>
    %cst_16 = arith.constant 0.353553385 : f32
    %22 = vector.broadcast %cst_16 : f32 to vector<16x8xf32>
    %23 = arith.mulf %21, %22 : vector<16x8xf32>
    %24 = vector.extract_strided_slice %17 {offsets = [0, 0], sizes = [16, 8], strides = [1, 1]} : vector<16x32xf32> to vector<16x8xf32>
    %25 = vector.extract_strided_slice %18 {offsets = [0, 0], sizes = [16, 8], strides = [1, 1]} : vector<16x32xf32> to vector<16x8xf32>
    %cst_17 = arith.constant dense<0.000000e+00> : vector<16x16xf32>
    %26 = tpu.matmul %23, %24, %cst_17 {dimension_numbers = #tpu.dot_dimension_numbers<[1], [1], [0], [0], [0, 0, 1, 0], [], []>} : vector<16x8xf32>, vector<16x8xf32>, vector<16x16xf32> -> vector<16x16xf32>
    %cst_18 = arith.constant dense<0xFF800000> : vector<16xf32>
    %27 = vector.multi_reduction <maximumf>, %26, %cst_18 [1] : vector<16x16xf32> to vector<16xf32>
    %28 = vector.shape_cast %27 : vector<16xf32> to vector<16x1xf32>
    %29 = vector.broadcast %28 : vector<16x1xf32> to vector<16x16xf32>
    %30 = arith.subf %26, %29 : vector<16x16xf32>
    %31 = math.exp %30 : vector<16x16xf32>
    %cst_19 = arith.constant dense<0.000000e+00> : vector<16xf32>
    %32 = vector.multi_reduction <add>, %31, %cst_19 [1] : vector<16x16xf32> to vector<16xf32>
    %33 = vector.shape_cast %32 : vector<16xf32> to vector<16x1xf32>
    %34 = tpu.reciprocal %33 {approx = true} : vector<16x1xf32> -> vector<16x1xf32>
    %35 = vector.broadcast %34 : vector<16x1xf32> to vector<16x16xf32>
    %36 = arith.mulf %31, %35 : vector<16x16xf32>
    %cst_20 = arith.constant dense<0.000000e+00> : vector<16x8xf32>
    %37 = tpu.matmul %36, %25, %cst_20 {dimension_numbers = #tpu.dot_dimension_numbers<[1], [0], [0], [1], [0, 0, 1, 1], [], []>} : vector<16x16xf32>, vector<16x8xf32>, vector<16x8xf32> -> vector<16x8xf32>
    %38 = vector.extract_strided_slice %20 {offsets = [0, 0], sizes = [8, 32], strides = [1, 1]} : vector<32x32xf32> to vector<8x32xf32>
    %cst_21 = arith.constant dense<0.000000e+00> : vector<16x32xf32>
    %39 = tpu.matmul %37, %38, %cst_21 {dimension_numbers = #tpu.dot_dimension_numbers<[1], [0], [0], [1], [0, 0, 1, 1], [], []>} : vector<16x8xf32>, vector<8x32xf32>, vector<16x32xf32> -> vector<16x32xf32>
    %40 = vector.extract_strided_slice %16 {offsets = [0, 8], sizes = [16, 8], strides = [1, 1]} : vector<16x32xf32> to vector<16x8xf32>
    %cst_22 = arith.constant 0.353553385 : f32
    %41 = vector.broadcast %cst_22 : f32 to vector<16x8xf32>
    %42 = arith.mulf %40, %41 : vector<16x8xf32>
    %43 = vector.extract_strided_slice %17 {offsets = [0, 8], sizes = [16, 8], strides = [1, 1]} : vector<16x32xf32> to vector<16x8xf32>
    %44 = vector.extract_strided_slice %18 {offsets = [0, 8], sizes = [16, 8], strides = [1, 1]} : vector<16x32xf32> to vector<16x8xf32>
    %cst_23 = arith.constant dense<0.000000e+00> : vector<16x16xf32>
    %45 = tpu.matmul %42, %43, %cst_23 {dimension_numbers = #tpu.dot_dimension_numbers<[1], [1], [0], [0], [0, 0, 1, 0], [], []>} : vector<16x8xf32>, vector<16x8xf32>, vector<16x16xf32> -> vector<16x16xf32>
    %cst_24 = arith.constant dense<0xFF800000> : vector<16xf32>
    %46 = vector.multi_reduction <maximumf>, %45, %cst_24 [1] : vector<16x16xf32> to vector<16xf32>
    %47 = vector.shape_cast %46 : vector<16xf32> to vector<16x1xf32>
    %48 = vector.broadcast %47 : vector<16x1xf32> to vector<16x16xf32>
    %49 = arith.subf %45, %48 : vector<16x16xf32>
    %50 = math.exp %49 : vector<16x16xf32>
    %cst_25 = arith.constant dense<0.000000e+00> : vector<16xf32>
    %51 = vector.multi_reduction <add>, %50, %cst_25 [1] : vector<16x16xf32> to vector<16xf32>
    %52 = vector.shape_cast %51 : vector<16xf32> to vector<16x1xf32>
    %53 = tpu.reciprocal %52 {approx = true} : vector<16x1xf32> -> vector<16x1xf32>
    %54 = vector.broadcast %53 : vector<16x1xf32> to vector<16x16xf32>
    %55 = arith.mulf %50, %54 : vector<16x16xf32>
    %cst_26 = arith.constant dense<0.000000e+00> : vector<16x8xf32>
    %56 = tpu.matmul %55, %44, %cst_26 {dimension_numbers = #tpu.dot_dimension_numbers<[1], [0], [0], [1], [0, 0, 1, 1], [], []>} : vector<16x16xf32>, vector<16x8xf32>, vector<16x8xf32> -> vector<16x8xf32>
    %57 = vector.extract_strided_slice %20 {offsets = [8, 0], sizes = [8, 32], strides = [1, 1]} : vector<32x32xf32> to vector<8x32xf32>
    %cst_27 = arith.constant dense<0.000000e+00> : vector<16x32xf32>
    %58 = tpu.matmul %56, %57, %cst_27 {dimension_numbers = #tpu.dot_dimension_numbers<[1], [0], [0], [1], [0, 0, 1, 1], [], []>} : vector<16x8xf32>, vector<8x32xf32>, vector<16x32xf32> -> vector<16x32xf32>
    %59 = arith.addf %39, %58 : vector<16x32xf32>
    %60 = vector.extract_strided_slice %16 {offsets = [0, 16], sizes = [16, 8], strides = [1, 1]} : vector<16x32xf32> to vector<16x8xf32>
    %cst_28 = arith.constant 0.353553385 : f32
    %61 = vector.broadcast %cst_28 : f32 to vector<16x8xf32>
    %62 = arith.mulf %60, %61 : vector<16x8xf32>
    %63 = vector.extract_strided_slice %17 {offsets = [0, 16], sizes = [16, 8], strides = [1, 1]} : vector<16x32xf32> to vector<16x8xf32>
    %64 = vector.extract_strided_slice %18 {offsets = [0, 16], sizes = [16, 8], strides = [1, 1]} : vector<16x32xf32> to vector<16x8xf32>
    %cst_29 = arith.constant dense<0.000000e+00> : vector<16x16xf32>
    %65 = tpu.matmul %62, %63, %cst_29 {dimension_numbers = #tpu.dot_dimension_numbers<[1], [1], [0], [0], [0, 0, 1, 0], [], []>} : vector<16x8xf32>, vector<16x8xf32>, vector<16x16xf32> -> vector<16x16xf32>
    %cst_30 = arith.constant dense<0xFF800000> : vector<16xf32>
    %66 = vector.multi_reduction <maximumf>, %65, %cst_30 [1] : vector<16x16xf32> to vector<16xf32>
    %67 = vector.shape_cast %66 : vector<16xf32> to vector<16x1xf32>
    %68 = vector.broadcast %67 : vector<16x1xf32> to vector<16x16xf32>
    %69 = arith.subf %65, %68 : vector<16x16xf32>
    %70 = math.exp %69 : vector<16x16xf32>
    %cst_31 = arith.constant dense<0.000000e+00> : vector<16xf32>
    %71 = vector.multi_reduction <add>, %70, %cst_31 [1] : vector<16x16xf32> to vector<16xf32>
    %72 = vector.shape_cast %71 : vector<16xf32> to vector<16x1xf32>
    %73 = tpu.reciprocal %72 {approx = true} : vector<16x1xf32> -> vector<16x1xf32>
    %74 = vector.broadcast %73 : vector<16x1xf32> to vector<16x16xf32>
    %75 = arith.mulf %70, %74 : vector<16x16xf32>
    %cst_32 = arith.constant dense<0.000000e+00> : vector<16x8xf32>
    %76 = tpu.matmul %75, %64, %cst_32 {dimension_numbers = #tpu.dot_dimension_numbers<[1], [0], [0], [1], [0, 0, 1, 1], [], []>} : vector<16x16xf32>, vector<16x8xf32>, vector<16x8xf32> -> vector<16x8xf32>
    %77 = vector.extract_strided_slice %20 {offsets = [16, 0], sizes = [8, 32], strides = [1, 1]} : vector<32x32xf32> to vector<8x32xf32>
    %cst_33 = arith.constant dense<0.000000e+00> : vector<16x32xf32>
    %78 = tpu.matmul %76, %77, %cst_33 {dimension_numbers = #tpu.dot_dimension_numbers<[1], [0], [0], [1], [0, 0, 1, 1], [], []>} : vector<16x8xf32>, vector<8x32xf32>, vector<16x32xf32> -> vector<16x32xf32>
    %79 = arith.addf %59, %78 : vector<16x32xf32>
    %80 = vector.extract_strided_slice %16 {offsets = [0, 24], sizes = [16, 8], strides = [1, 1]} : vector<16x32xf32> to vector<16x8xf32>
    %cst_34 = arith.constant 0.353553385 : f32
    %81 = vector.broadcast %cst_34 : f32 to vector<16x8xf32>
    %82 = arith.mulf %80, %81 : vector<16x8xf32>
    %83 = vector.extract_strided_slice %17 {offsets = [0, 24], sizes = [16, 8], strides = [1, 1]} : vector<16x32xf32> to vector<16x8xf32>
    %84 = vector.extract_strided_slice %18 {offsets = [0, 24], sizes = [16, 8], strides = [1, 1]} : vector<16x32xf32> to vector<16x8xf32>
    %cst_35 = arith.constant dense<0.000000e+00> : vector<16x16xf32>
    %85 = tpu.matmul %82, %83, %cst_35 {dimension_numbers = #tpu.dot_dimension_numbers<[1], [1], [0], [0], [0, 0, 1, 0], [], []>} : vector<16x8xf32>, vector<16x8xf32>, vector<16x16xf32> -> vector<16x16xf32>
    %cst_36 = arith.constant dense<0xFF800000> : vector<16xf32>
    %86 = vector.multi_reduction <maximumf>, %85, %cst_36 [1] : vector<16x16xf32> to vector<16xf32>
    %87 = vector.shape_cast %86 : vector<16xf32> to vector<16x1xf32>
    %88 = vector.broadcast %87 : vector<16x1xf32> to vector<16x16xf32>
    %89 = arith.subf %85, %88 : vector<16x16xf32>
    %90 = math.exp %89 : vector<16x16xf32>
    %cst_37 = arith.constant dense<0.000000e+00> : vector<16xf32>
    %91 = vector.multi_reduction <add>, %90, %cst_37 [1] : vector<16x16xf32> to vector<16xf32>
    %92 = vector.shape_cast %91 : vector<16xf32> to vector<16x1xf32>
    %93 = tpu.reciprocal %92 {approx = true} : vector<16x1xf32> -> vector<16x1xf32>
    %94 = vector.broadcast %93 : vector<16x1xf32> to vector<16x16xf32>
    %95 = arith.mulf %90, %94 : vector<16x16xf32>
    %cst_38 = arith.constant dense<0.000000e+00> : vector<16x8xf32>
    %96 = tpu.matmul %95, %84, %cst_38 {dimension_numbers = #tpu.dot_dimension_numbers<[1], [0], [0], [1], [0, 0, 1, 1], [], []>} : vector<16x16xf32>, vector<16x8xf32>, vector<16x8xf32> -> vector<16x8xf32>
    %97 = vector.extract_strided_slice %20 {offsets = [24, 0], sizes = [8, 32], strides = [1, 1]} : vector<32x32xf32> to vector<8x32xf32>
    %cst_39 = arith.constant dense<0.000000e+00> : vector<16x32xf32>
    %98 = tpu.matmul %96, %97, %cst_39 {dimension_numbers = #tpu.dot_dimension_numbers<[1], [0], [0], [1], [0, 0, 1, 1], [], []>} : vector<16x8xf32>, vector<8x32xf32>, vector<16x32xf32> -> vector<16x32xf32>
    %99 = arith.addf %79, %98 : vector<16x32xf32>
    %c0_40 = arith.constant 0 : index
    %c0_41 = arith.constant 0 : index
    %c0_42 = arith.constant 0 : index
    %100 = vector.load %arg7[%c0_40, %c0_41, %c0_42] : memref<2x1x32xf32, #tpu.memory_space<vmem>>, vector<1x1x32xf32>
    %101 = vector.shape_cast %100 : vector<1x1x32xf32> to vector<1x32xf32>
    %102 = vector.broadcast %101 : vector<1x32xf32> to vector<16x32xf32>
    %103 = arith.addf %99, %102 : vector<16x32xf32>
    %104 = arith.addf %7, %103 : vector<16x32xf32>
    %c0_43 = arith.constant 0 : index
    %c0_44 = arith.constant 0 : index
    %c0_45 = arith.constant 0 : index
    %105 = vector.load %arg8[%c0_43, %c0_44, %c0_45] : memref<2x1x32xf32, #tpu.memory_space<vmem>>, vector<1x1x32xf32>
    %106 = vector.shape_cast %105 : vector<1x1x32xf32> to vector<1x32xf32>
    %c0_46 = arith.constant 0 : index
    %c0_47 = arith.constant 0 : index
    %c0_48 = arith.constant 0 : index
    %107 = vector.load %arg9[%c0_46, %c0_47, %c0_48] : memref<2x1x32xf32, #tpu.memory_space<vmem>>, vector<1x1x32xf32>
    %108 = vector.shape_cast %107 : vector<1x1x32xf32> to vector<1x32xf32>
    %cst_49 = arith.constant dense<0.000000e+00> : vector<16xf32>
    %109 = vector.multi_reduction <add>, %104, %cst_49 [1] : vector<16x32xf32> to vector<16xf32>
    %110 = vector.shape_cast %109 : vector<16xf32> to vector<16x1xf32>
    %cst_50 = arith.constant 3.200000e+01 : f32
    %111 = vector.broadcast %cst_50 : f32 to vector<16x1xf32>
    %112 = arith.divf %110, %111 : vector<16x1xf32>
    %113 = vector.broadcast %112 : vector<16x1xf32> to vector<16x32xf32>
    %114 = arith.subf %104, %113 : vector<16x32xf32>
    %115 = arith.mulf %114, %114 : vector<16x32xf32>
    %cst_51 = arith.constant dense<0.000000e+00> : vector<16xf32>
    %116 = vector.multi_reduction <add>, %115, %cst_51 [1] : vector<16x32xf32> to vector<16xf32>
    %117 = vector.shape_cast %116 : vector<16xf32> to vector<16x1xf32>
    %cst_52 = arith.constant 3.200000e+01 : f32
    %118 = vector.broadcast %cst_52 : f32 to vector<16x1xf32>
    %119 = arith.divf %117, %118 : vector<16x1xf32>
    %cst_53 = arith.constant 9.99999974E-6 : f32
    %120 = vector.broadcast %cst_53 : f32 to vector<16x1xf32>
    %121 = arith.addf %119, %120 : vector<16x1xf32>
    %122 = math.rsqrt %121 : vector<16x1xf32>
    %123 = vector.broadcast %122 : vector<16x1xf32> to vector<16x32xf32>
    %124 = arith.mulf %114, %123 : vector<16x32xf32>
    %125 = vector.broadcast %106 : vector<1x32xf32> to vector<16x32xf32>
    %126 = arith.mulf %124, %125 : vector<16x32xf32>
    %127 = vector.broadcast %108 : vector<1x32xf32> to vector<16x32xf32>
    %128 = arith.addf %126, %127 : vector<16x32xf32>
    %129 = arith.truncf %128 : vector<16x32xf32> to vector<16x32xbf16>
    %c0_54 = arith.constant 0 : index
    %c0_55 = arith.constant 0 : index
    %c0_56 = arith.constant 0 : index
    %130 = vector.load %arg10[%c0_54, %c0_55, %c0_56] : memref<2x32x64xbf16, #tpu.memory_space<vmem>>, vector<1x32x64xbf16>
    %131 = vector.shape_cast %130 : vector<1x32x64xbf16> to vector<32x64xbf16>
    %cst_57 = arith.constant dense<0.000000e+00> : vector<16x64xf32>
    %132 = tpu.matmul %129, %131, %cst_57 {dimension_numbers = #tpu.dot_dimension_numbers<[1], [0], [0], [1], [0, 0, 1, 1], [], []>} : vector<16x32xbf16>, vector<32x64xbf16>, vector<16x64xf32> -> vector<16x64xf32>
    %c0_58 = arith.constant 0 : index
    %c0_59 = arith.constant 0 : index
    %c0_60 = arith.constant 0 : index
    %133 = vector.load %arg11[%c0_58, %c0_59, %c0_60] : memref<2x1x64xf32, #tpu.memory_space<vmem>>, vector<1x1x64xf32>
    %134 = vector.shape_cast %133 : vector<1x1x64xf32> to vector<1x64xf32>
    %135 = vector.broadcast %134 : vector<1x64xf32> to vector<16x64xf32>
    %136 = arith.addf %132, %135 : vector<16x64xf32>
    %cst_61 = arith.constant 0.000000e+00 : f32
    %137 = vector.broadcast %cst_61 : f32 to vector<16x64xf32>
    %138 = arith.maximumf %136, %137 : vector<16x64xf32>
    %139 = arith.truncf %138 : vector<16x64xf32> to vector<16x64xbf16>
    %c0_62 = arith.constant 0 : index
    %c0_63 = arith.constant 0 : index
    %c0_64 = arith.constant 0 : index
    %140 = vector.load %arg12[%c0_62, %c0_63, %c0_64] : memref<2x64x32xbf16, #tpu.memory_space<vmem>>, vector<1x64x32xbf16>
    %141 = vector.shape_cast %140 : vector<1x64x32xbf16> to vector<64x32xbf16>
    %cst_65 = arith.constant dense<0.000000e+00> : vector<16x32xf32>
    %142 = tpu.matmul %139, %141, %cst_65 {dimension_numbers = #tpu.dot_dimension_numbers<[1], [0], [0], [1], [0, 0, 1, 1], [], []>} : vector<16x64xbf16>, vector<64x32xbf16>, vector<16x32xf32> -> vector<16x32xf32>
    %c0_66 = arith.constant 0 : index
    %c0_67 = arith.constant 0 : index
    %c0_68 = arith.constant 0 : index
    %143 = vector.load %arg13[%c0_66, %c0_67, %c0_68] : memref<2x1x32xf32, #tpu.memory_space<vmem>>, vector<1x1x32xf32>
    %144 = vector.shape_cast %143 : vector<1x1x32xf32> to vector<1x32xf32>
    %145 = vector.broadcast %144 : vector<1x32xf32> to vector<16x32xf32>
    %146 = arith.addf %142, %145 : vector<16x32xf32>
    %147 = arith.addf %128, %146 : vector<16x32xf32>
    %c0_69 = arith.constant 0 : index
    %c0_70 = arith.constant 0 : index
    %c0_71 = arith.constant 0 : index
    %148 = vector.load %arg14[%c0_69, %c0_70, %c0_71] : memref<2x1x32xf32, #tpu.memory_space<vmem>>, vector<1x1x32xf32>
    %149 = vector.shape_cast %148 : vector<1x1x32xf32> to vector<1x32xf32>
    %c0_72 = arith.constant 0 : index
    %c0_73 = arith.constant 0 : index
    %c0_74 = arith.constant 0 : index
    %150 = vector.load %arg15[%c0_72, %c0_73, %c0_74] : memref<2x1x32xf32, #tpu.memory_space<vmem>>, vector<1x1x32xf32>
    %151 = vector.shape_cast %150 : vector<1x1x32xf32> to vector<1x32xf32>
    %cst_75 = arith.constant dense<0.000000e+00> : vector<16xf32>
    %152 = vector.multi_reduction <add>, %147, %cst_75 [1] : vector<16x32xf32> to vector<16xf32>
    %153 = vector.shape_cast %152 : vector<16xf32> to vector<16x1xf32>
    %cst_76 = arith.constant 3.200000e+01 : f32
    %154 = vector.broadcast %cst_76 : f32 to vector<16x1xf32>
    %155 = arith.divf %153, %154 : vector<16x1xf32>
    %156 = vector.broadcast %155 : vector<16x1xf32> to vector<16x32xf32>
    %157 = arith.subf %147, %156 : vector<16x32xf32>
    %158 = arith.mulf %157, %157 : vector<16x32xf32>
    %cst_77 = arith.constant dense<0.000000e+00> : vector<16xf32>
    %159 = vector.multi_reduction <add>, %158, %cst_77 [1] : vector<16x32xf32> to vector<16xf32>
    %160 = vector.shape_cast %159 : vector<16xf32> to vector<16x1xf32>
    %cst_78 = arith.constant 3.200000e+01 : f32
    %161 = vector.broadcast %cst_78 : f32 to vector<16x1xf32>
    %162 = arith.divf %160, %161 : vector<16x1xf32>
    %cst_79 = arith.constant 9.99999974E-6 : f32
    %163 = vector.broadcast %cst_79 : f32 to vector<16x1xf32>
    %164 = arith.addf %162, %163 : vector<16x1xf32>
    %165 = math.rsqrt %164 : vector<16x1xf32>
    %166 = vector.broadcast %165 : vector<16x1xf32> to vector<16x32xf32>
    %167 = arith.mulf %157, %166 : vector<16x32xf32>
    %168 = vector.broadcast %149 : vector<1x32xf32> to vector<16x32xf32>
    %169 = arith.mulf %167, %168 : vector<16x32xf32>
    %170 = vector.broadcast %151 : vector<1x32xf32> to vector<16x32xf32>
    %171 = arith.addf %169, %170 : vector<16x32xf32>
    %172 = arith.truncf %171 : vector<16x32xf32> to vector<16x32xbf16>
    %c1 = arith.constant 1 : index
    %c0_80 = arith.constant 0 : index
    %c0_81 = arith.constant 0 : index
    %173 = vector.load %arg4[%c1, %c0_80, %c0_81] : memref<2x32x96xbf16, #tpu.memory_space<vmem>>, vector<1x32x96xbf16>
    %174 = vector.shape_cast %173 : vector<1x32x96xbf16> to vector<32x96xbf16>
    %cst_82 = arith.constant dense<0.000000e+00> : vector<16x96xf32>
    %175 = tpu.matmul %172, %174, %cst_82 {dimension_numbers = #tpu.dot_dimension_numbers<[1], [0], [0], [1], [0, 0, 1, 1], [], []>} : vector<16x32xbf16>, vector<32x96xbf16>, vector<16x96xf32> -> vector<16x96xf32>
    %c1_83 = arith.constant 1 : index
    %c0_84 = arith.constant 0 : index
    %c0_85 = arith.constant 0 : index
    %176 = vector.load %arg5[%c1_83, %c0_84, %c0_85] : memref<2x1x96xf32, #tpu.memory_space<vmem>>, vector<1x1x96xf32>
    %177 = vector.shape_cast %176 : vector<1x1x96xf32> to vector<1x96xf32>
    %178 = vector.broadcast %177 : vector<1x96xf32> to vector<16x96xf32>
    %179 = arith.addf %175, %178 : vector<16x96xf32>
    %180 = vector.extract_strided_slice %179 {offsets = [0, 0], sizes = [16, 32], strides = [1, 1]} : vector<16x96xf32> to vector<16x32xf32>
    %181 = vector.extract_strided_slice %179 {offsets = [0, 32], sizes = [16, 32], strides = [1, 1]} : vector<16x96xf32> to vector<16x32xf32>
    %182 = vector.extract_strided_slice %179 {offsets = [0, 64], sizes = [16, 32], strides = [1, 1]} : vector<16x96xf32> to vector<16x32xf32>
    %c1_86 = arith.constant 1 : index
    %c0_87 = arith.constant 0 : index
    %c0_88 = arith.constant 0 : index
    %183 = vector.load %arg6[%c1_86, %c0_87, %c0_88] : memref<2x32x32xf32, #tpu.memory_space<vmem>>, vector<1x32x32xf32>
    %184 = vector.shape_cast %183 : vector<1x32x32xf32> to vector<32x32xf32>
    %185 = vector.extract_strided_slice %180 {offsets = [0, 0], sizes = [16, 8], strides = [1, 1]} : vector<16x32xf32> to vector<16x8xf32>
    %cst_89 = arith.constant 0.353553385 : f32
    %186 = vector.broadcast %cst_89 : f32 to vector<16x8xf32>
    %187 = arith.mulf %185, %186 : vector<16x8xf32>
    %188 = vector.extract_strided_slice %181 {offsets = [0, 0], sizes = [16, 8], strides = [1, 1]} : vector<16x32xf32> to vector<16x8xf32>
    %189 = vector.extract_strided_slice %182 {offsets = [0, 0], sizes = [16, 8], strides = [1, 1]} : vector<16x32xf32> to vector<16x8xf32>
    %cst_90 = arith.constant dense<0.000000e+00> : vector<16x16xf32>
    %190 = tpu.matmul %187, %188, %cst_90 {dimension_numbers = #tpu.dot_dimension_numbers<[1], [1], [0], [0], [0, 0, 1, 0], [], []>} : vector<16x8xf32>, vector<16x8xf32>, vector<16x16xf32> -> vector<16x16xf32>
    %cst_91 = arith.constant dense<0xFF800000> : vector<16xf32>
    %191 = vector.multi_reduction <maximumf>, %190, %cst_91 [1] : vector<16x16xf32> to vector<16xf32>
    %192 = vector.shape_cast %191 : vector<16xf32> to vector<16x1xf32>
    %193 = vector.broadcast %192 : vector<16x1xf32> to vector<16x16xf32>
    %194 = arith.subf %190, %193 : vector<16x16xf32>
    %195 = math.exp %194 : vector<16x16xf32>
    %cst_92 = arith.constant dense<0.000000e+00> : vector<16xf32>
    %196 = vector.multi_reduction <add>, %195, %cst_92 [1] : vector<16x16xf32> to vector<16xf32>
    %197 = vector.shape_cast %196 : vector<16xf32> to vector<16x1xf32>
    %198 = tpu.reciprocal %197 {approx = true} : vector<16x1xf32> -> vector<16x1xf32>
    %199 = vector.broadcast %198 : vector<16x1xf32> to vector<16x16xf32>
    %200 = arith.mulf %195, %199 : vector<16x16xf32>
    %cst_93 = arith.constant dense<0.000000e+00> : vector<16x8xf32>
    %201 = tpu.matmul %200, %189, %cst_93 {dimension_numbers = #tpu.dot_dimension_numbers<[1], [0], [0], [1], [0, 0, 1, 1], [], []>} : vector<16x16xf32>, vector<16x8xf32>, vector<16x8xf32> -> vector<16x8xf32>
    %202 = vector.extract_strided_slice %184 {offsets = [0, 0], sizes = [8, 32], strides = [1, 1]} : vector<32x32xf32> to vector<8x32xf32>
    %cst_94 = arith.constant dense<0.000000e+00> : vector<16x32xf32>
    %203 = tpu.matmul %201, %202, %cst_94 {dimension_numbers = #tpu.dot_dimension_numbers<[1], [0], [0], [1], [0, 0, 1, 1], [], []>} : vector<16x8xf32>, vector<8x32xf32>, vector<16x32xf32> -> vector<16x32xf32>
    %204 = vector.extract_strided_slice %180 {offsets = [0, 8], sizes = [16, 8], strides = [1, 1]} : vector<16x32xf32> to vector<16x8xf32>
    %cst_95 = arith.constant 0.353553385 : f32
    %205 = vector.broadcast %cst_95 : f32 to vector<16x8xf32>
    %206 = arith.mulf %204, %205 : vector<16x8xf32>
    %207 = vector.extract_strided_slice %181 {offsets = [0, 8], sizes = [16, 8], strides = [1, 1]} : vector<16x32xf32> to vector<16x8xf32>
    %208 = vector.extract_strided_slice %182 {offsets = [0, 8], sizes = [16, 8], strides = [1, 1]} : vector<16x32xf32> to vector<16x8xf32>
    %cst_96 = arith.constant dense<0.000000e+00> : vector<16x16xf32>
    %209 = tpu.matmul %206, %207, %cst_96 {dimension_numbers = #tpu.dot_dimension_numbers<[1], [1], [0], [0], [0, 0, 1, 0], [], []>} : vector<16x8xf32>, vector<16x8xf32>, vector<16x16xf32> -> vector<16x16xf32>
    %cst_97 = arith.constant dense<0xFF800000> : vector<16xf32>
    %210 = vector.multi_reduction <maximumf>, %209, %cst_97 [1] : vector<16x16xf32> to vector<16xf32>
    %211 = vector.shape_cast %210 : vector<16xf32> to vector<16x1xf32>
    %212 = vector.broadcast %211 : vector<16x1xf32> to vector<16x16xf32>
    %213 = arith.subf %209, %212 : vector<16x16xf32>
    %214 = math.exp %213 : vector<16x16xf32>
    %cst_98 = arith.constant dense<0.000000e+00> : vector<16xf32>
    %215 = vector.multi_reduction <add>, %214, %cst_98 [1] : vector<16x16xf32> to vector<16xf32>
    %216 = vector.shape_cast %215 : vector<16xf32> to vector<16x1xf32>
    %217 = tpu.reciprocal %216 {approx = true} : vector<16x1xf32> -> vector<16x1xf32>
    %218 = vector.broadcast %217 : vector<16x1xf32> to vector<16x16xf32>
    %219 = arith.mulf %214, %218 : vector<16x16xf32>
    %cst_99 = arith.constant dense<0.000000e+00> : vector<16x8xf32>
    %220 = tpu.matmul %219, %208, %cst_99 {dimension_numbers = #tpu.dot_dimension_numbers<[1], [0], [0], [1], [0, 0, 1, 1], [], []>} : vector<16x16xf32>, vector<16x8xf32>, vector<16x8xf32> -> vector<16x8xf32>
    %221 = vector.extract_strided_slice %184 {offsets = [8, 0], sizes = [8, 32], strides = [1, 1]} : vector<32x32xf32> to vector<8x32xf32>
    %cst_100 = arith.constant dense<0.000000e+00> : vector<16x32xf32>
    %222 = tpu.matmul %220, %221, %cst_100 {dimension_numbers = #tpu.dot_dimension_numbers<[1], [0], [0], [1], [0, 0, 1, 1], [], []>} : vector<16x8xf32>, vector<8x32xf32>, vector<16x32xf32> -> vector<16x32xf32>
    %223 = arith.addf %203, %222 : vector<16x32xf32>
    %224 = vector.extract_strided_slice %180 {offsets = [0, 16], sizes = [16, 8], strides = [1, 1]} : vector<16x32xf32> to vector<16x8xf32>
    %cst_101 = arith.constant 0.353553385 : f32
    %225 = vector.broadcast %cst_101 : f32 to vector<16x8xf32>
    %226 = arith.mulf %224, %225 : vector<16x8xf32>
    %227 = vector.extract_strided_slice %181 {offsets = [0, 16], sizes = [16, 8], strides = [1, 1]} : vector<16x32xf32> to vector<16x8xf32>
    %228 = vector.extract_strided_slice %182 {offsets = [0, 16], sizes = [16, 8], strides = [1, 1]} : vector<16x32xf32> to vector<16x8xf32>
    %cst_102 = arith.constant dense<0.000000e+00> : vector<16x16xf32>
    %229 = tpu.matmul %226, %227, %cst_102 {dimension_numbers = #tpu.dot_dimension_numbers<[1], [1], [0], [0], [0, 0, 1, 0], [], []>} : vector<16x8xf32>, vector<16x8xf32>, vector<16x16xf32> -> vector<16x16xf32>
    %cst_103 = arith.constant dense<0xFF800000> : vector<16xf32>
    %230 = vector.multi_reduction <maximumf>, %229, %cst_103 [1] : vector<16x16xf32> to vector<16xf32>
    %231 = vector.shape_cast %230 : vector<16xf32> to vector<16x1xf32>
    %232 = vector.broadcast %231 : vector<16x1xf32> to vector<16x16xf32>
    %233 = arith.subf %229, %232 : vector<16x16xf32>
    %234 = math.exp %233 : vector<16x16xf32>
    %cst_104 = arith.constant dense<0.000000e+00> : vector<16xf32>
    %235 = vector.multi_reduction <add>, %234, %cst_104 [1] : vector<16x16xf32> to vector<16xf32>
    %236 = vector.shape_cast %235 : vector<16xf32> to vector<16x1xf32>
    %237 = tpu.reciprocal %236 {approx = true} : vector<16x1xf32> -> vector<16x1xf32>
    %238 = vector.broadcast %237 : vector<16x1xf32> to vector<16x16xf32>
    %239 = arith.mulf %234, %238 : vector<16x16xf32>
    %cst_105 = arith.constant dense<0.000000e+00> : vector<16x8xf32>
    %240 = tpu.matmul %239, %228, %cst_105 {dimension_numbers = #tpu.dot_dimension_numbers<[1], [0], [0], [1], [0, 0, 1, 1], [], []>} : vector<16x16xf32>, vector<16x8xf32>, vector<16x8xf32> -> vector<16x8xf32>
    %241 = vector.extract_strided_slice %184 {offsets = [16, 0], sizes = [8, 32], strides = [1, 1]} : vector<32x32xf32> to vector<8x32xf32>
    %cst_106 = arith.constant dense<0.000000e+00> : vector<16x32xf32>
    %242 = tpu.matmul %240, %241, %cst_106 {dimension_numbers = #tpu.dot_dimension_numbers<[1], [0], [0], [1], [0, 0, 1, 1], [], []>} : vector<16x8xf32>, vector<8x32xf32>, vector<16x32xf32> -> vector<16x32xf32>
    %243 = arith.addf %223, %242 : vector<16x32xf32>
    %244 = vector.extract_strided_slice %180 {offsets = [0, 24], sizes = [16, 8], strides = [1, 1]} : vector<16x32xf32> to vector<16x8xf32>
    %cst_107 = arith.constant 0.353553385 : f32
    %245 = vector.broadcast %cst_107 : f32 to vector<16x8xf32>
    %246 = arith.mulf %244, %245 : vector<16x8xf32>
    %247 = vector.extract_strided_slice %181 {offsets = [0, 24], sizes = [16, 8], strides = [1, 1]} : vector<16x32xf32> to vector<16x8xf32>
    %248 = vector.extract_strided_slice %182 {offsets = [0, 24], sizes = [16, 8], strides = [1, 1]} : vector<16x32xf32> to vector<16x8xf32>
    %cst_108 = arith.constant dense<0.000000e+00> : vector<16x16xf32>
    %249 = tpu.matmul %246, %247, %cst_108 {dimension_numbers = #tpu.dot_dimension_numbers<[1], [1], [0], [0], [0, 0, 1, 0], [], []>} : vector<16x8xf32>, vector<16x8xf32>, vector<16x16xf32> -> vector<16x16xf32>
    %cst_109 = arith.constant dense<0xFF800000> : vector<16xf32>
    %250 = vector.multi_reduction <maximumf>, %249, %cst_109 [1] : vector<16x16xf32> to vector<16xf32>
    %251 = vector.shape_cast %250 : vector<16xf32> to vector<16x1xf32>
    %252 = vector.broadcast %251 : vector<16x1xf32> to vector<16x16xf32>
    %253 = arith.subf %249, %252 : vector<16x16xf32>
    %254 = math.exp %253 : vector<16x16xf32>
    %cst_110 = arith.constant dense<0.000000e+00> : vector<16xf32>
    %255 = vector.multi_reduction <add>, %254, %cst_110 [1] : vector<16x16xf32> to vector<16xf32>
    %256 = vector.shape_cast %255 : vector<16xf32> to vector<16x1xf32>
    %257 = tpu.reciprocal %256 {approx = true} : vector<16x1xf32> -> vector<16x1xf32>
    %258 = vector.broadcast %257 : vector<16x1xf32> to vector<16x16xf32>
    %259 = arith.mulf %254, %258 : vector<16x16xf32>
    %cst_111 = arith.constant dense<0.000000e+00> : vector<16x8xf32>
    %260 = tpu.matmul %259, %248, %cst_111 {dimension_numbers = #tpu.dot_dimension_numbers<[1], [0], [0], [1], [0, 0, 1, 1], [], []>} : vector<16x16xf32>, vector<16x8xf32>, vector<16x8xf32> -> vector<16x8xf32>
    %261 = vector.extract_strided_slice %184 {offsets = [24, 0], sizes = [8, 32], strides = [1, 1]} : vector<32x32xf32> to vector<8x32xf32>
    %cst_112 = arith.constant dense<0.000000e+00> : vector<16x32xf32>
    %262 = tpu.matmul %260, %261, %cst_112 {dimension_numbers = #tpu.dot_dimension_numbers<[1], [0], [0], [1], [0, 0, 1, 1], [], []>} : vector<16x8xf32>, vector<8x32xf32>, vector<16x32xf32> -> vector<16x32xf32>
    %263 = arith.addf %243, %262 : vector<16x32xf32>
    %c1_113 = arith.constant 1 : index
    %c0_114 = arith.constant 0 : index
    %c0_115 = arith.constant 0 : index
    %264 = vector.load %arg7[%c1_113, %c0_114, %c0_115] : memref<2x1x32xf32, #tpu.memory_space<vmem>>, vector<1x1x32xf32>
    %265 = vector.shape_cast %264 : vector<1x1x32xf32> to vector<1x32xf32>
    %266 = vector.broadcast %265 : vector<1x32xf32> to vector<16x32xf32>
    %267 = arith.addf %263, %266 : vector<16x32xf32>
    %268 = arith.addf %171, %267 : vector<16x32xf32>
    %c1_116 = arith.constant 1 : index
    %c0_117 = arith.constant 0 : index
    %c0_118 = arith.constant 0 : index
    %269 = vector.load %arg8[%c1_116, %c0_117, %c0_118] : memref<2x1x32xf32, #tpu.memory_space<vmem>>, vector<1x1x32xf32>
    %270 = vector.shape_cast %269 : vector<1x1x32xf32> to vector<1x32xf32>
    %c1_119 = arith.constant 1 : index
    %c0_120 = arith.constant 0 : index
    %c0_121 = arith.constant 0 : index
    %271 = vector.load %arg9[%c1_119, %c0_120, %c0_121] : memref<2x1x32xf32, #tpu.memory_space<vmem>>, vector<1x1x32xf32>
    %272 = vector.shape_cast %271 : vector<1x1x32xf32> to vector<1x32xf32>
    %cst_122 = arith.constant dense<0.000000e+00> : vector<16xf32>
    %273 = vector.multi_reduction <add>, %268, %cst_122 [1] : vector<16x32xf32> to vector<16xf32>
    %274 = vector.shape_cast %273 : vector<16xf32> to vector<16x1xf32>
    %cst_123 = arith.constant 3.200000e+01 : f32
    %275 = vector.broadcast %cst_123 : f32 to vector<16x1xf32>
    %276 = arith.divf %274, %275 : vector<16x1xf32>
    %277 = vector.broadcast %276 : vector<16x1xf32> to vector<16x32xf32>
    %278 = arith.subf %268, %277 : vector<16x32xf32>
    %279 = arith.mulf %278, %278 : vector<16x32xf32>
    %cst_124 = arith.constant dense<0.000000e+00> : vector<16xf32>
    %280 = vector.multi_reduction <add>, %279, %cst_124 [1] : vector<16x32xf32> to vector<16xf32>
    %281 = vector.shape_cast %280 : vector<16xf32> to vector<16x1xf32>
    %cst_125 = arith.constant 3.200000e+01 : f32
    %282 = vector.broadcast %cst_125 : f32 to vector<16x1xf32>
    %283 = arith.divf %281, %282 : vector<16x1xf32>
    %cst_126 = arith.constant 9.99999974E-6 : f32
    %284 = vector.broadcast %cst_126 : f32 to vector<16x1xf32>
    %285 = arith.addf %283, %284 : vector<16x1xf32>
    %286 = math.rsqrt %285 : vector<16x1xf32>
    %287 = vector.broadcast %286 : vector<16x1xf32> to vector<16x32xf32>
    %288 = arith.mulf %278, %287 : vector<16x32xf32>
    %289 = vector.broadcast %270 : vector<1x32xf32> to vector<16x32xf32>
    %290 = arith.mulf %288, %289 : vector<16x32xf32>
    %291 = vector.broadcast %272 : vector<1x32xf32> to vector<16x32xf32>
    %292 = arith.addf %290, %291 : vector<16x32xf32>
    %293 = arith.truncf %292 : vector<16x32xf32> to vector<16x32xbf16>
    %c1_127 = arith.constant 1 : index
    %c0_128 = arith.constant 0 : index
    %c0_129 = arith.constant 0 : index
    %294 = vector.load %arg10[%c1_127, %c0_128, %c0_129] : memref<2x32x64xbf16, #tpu.memory_space<vmem>>, vector<1x32x64xbf16>
    %295 = vector.shape_cast %294 : vector<1x32x64xbf16> to vector<32x64xbf16>
    %cst_130 = arith.constant dense<0.000000e+00> : vector<16x64xf32>
    %296 = tpu.matmul %293, %295, %cst_130 {dimension_numbers = #tpu.dot_dimension_numbers<[1], [0], [0], [1], [0, 0, 1, 1], [], []>} : vector<16x32xbf16>, vector<32x64xbf16>, vector<16x64xf32> -> vector<16x64xf32>
    %c1_131 = arith.constant 1 : index
    %c0_132 = arith.constant 0 : index
    %c0_133 = arith.constant 0 : index
    %297 = vector.load %arg11[%c1_131, %c0_132, %c0_133] : memref<2x1x64xf32, #tpu.memory_space<vmem>>, vector<1x1x64xf32>
    %298 = vector.shape_cast %297 : vector<1x1x64xf32> to vector<1x64xf32>
    %299 = vector.broadcast %298 : vector<1x64xf32> to vector<16x64xf32>
    %300 = arith.addf %296, %299 : vector<16x64xf32>
    %cst_134 = arith.constant 0.000000e+00 : f32
    %301 = vector.broadcast %cst_134 : f32 to vector<16x64xf32>
    %302 = arith.maximumf %300, %301 : vector<16x64xf32>
    %303 = arith.truncf %302 : vector<16x64xf32> to vector<16x64xbf16>
    %c1_135 = arith.constant 1 : index
    %c0_136 = arith.constant 0 : index
    %c0_137 = arith.constant 0 : index
    %304 = vector.load %arg12[%c1_135, %c0_136, %c0_137] : memref<2x64x32xbf16, #tpu.memory_space<vmem>>, vector<1x64x32xbf16>
    %305 = vector.shape_cast %304 : vector<1x64x32xbf16> to vector<64x32xbf16>
    %cst_138 = arith.constant dense<0.000000e+00> : vector<16x32xf32>
    %306 = tpu.matmul %303, %305, %cst_138 {dimension_numbers = #tpu.dot_dimension_numbers<[1], [0], [0], [1], [0, 0, 1, 1], [], []>} : vector<16x64xbf16>, vector<64x32xbf16>, vector<16x32xf32> -> vector<16x32xf32>
    %c1_139 = arith.constant 1 : index
    %c0_140 = arith.constant 0 : index
    %c0_141 = arith.constant 0 : index
    %307 = vector.load %arg13[%c1_139, %c0_140, %c0_141] : memref<2x1x32xf32, #tpu.memory_space<vmem>>, vector<1x1x32xf32>
    %308 = vector.shape_cast %307 : vector<1x1x32xf32> to vector<1x32xf32>
    %309 = vector.broadcast %308 : vector<1x32xf32> to vector<16x32xf32>
    %310 = arith.addf %306, %309 : vector<16x32xf32>
    %311 = arith.addf %292, %310 : vector<16x32xf32>
    %c1_142 = arith.constant 1 : index
    %c0_143 = arith.constant 0 : index
    %c0_144 = arith.constant 0 : index
    %312 = vector.load %arg14[%c1_142, %c0_143, %c0_144] : memref<2x1x32xf32, #tpu.memory_space<vmem>>, vector<1x1x32xf32>
    %313 = vector.shape_cast %312 : vector<1x1x32xf32> to vector<1x32xf32>
    %c1_145 = arith.constant 1 : index
    %c0_146 = arith.constant 0 : index
    %c0_147 = arith.constant 0 : index
    %314 = vector.load %arg15[%c1_145, %c0_146, %c0_147] : memref<2x1x32xf32, #tpu.memory_space<vmem>>, vector<1x1x32xf32>
    %315 = vector.shape_cast %314 : vector<1x1x32xf32> to vector<1x32xf32>
    %cst_148 = arith.constant dense<0.000000e+00> : vector<16xf32>
    %316 = vector.multi_reduction <add>, %311, %cst_148 [1] : vector<16x32xf32> to vector<16xf32>
    %317 = vector.shape_cast %316 : vector<16xf32> to vector<16x1xf32>
    %cst_149 = arith.constant 3.200000e+01 : f32
    %318 = vector.broadcast %cst_149 : f32 to vector<16x1xf32>
    %319 = arith.divf %317, %318 : vector<16x1xf32>
    %320 = vector.broadcast %319 : vector<16x1xf32> to vector<16x32xf32>
    %321 = arith.subf %311, %320 : vector<16x32xf32>
    %322 = arith.mulf %321, %321 : vector<16x32xf32>
    %cst_150 = arith.constant dense<0.000000e+00> : vector<16xf32>
    %323 = vector.multi_reduction <add>, %322, %cst_150 [1] : vector<16x32xf32> to vector<16xf32>
    %324 = vector.shape_cast %323 : vector<16xf32> to vector<16x1xf32>
    %cst_151 = arith.constant 3.200000e+01 : f32
    %325 = vector.broadcast %cst_151 : f32 to vector<16x1xf32>
    %326 = arith.divf %324, %325 : vector<16x1xf32>
    %cst_152 = arith.constant 9.99999974E-6 : f32
    %327 = vector.broadcast %cst_152 : f32 to vector<16x1xf32>
    %328 = arith.addf %326, %327 : vector<16x1xf32>
    %329 = math.rsqrt %328 : vector<16x1xf32>
    %330 = vector.broadcast %329 : vector<16x1xf32> to vector<16x32xf32>
    %331 = arith.mulf %321, %330 : vector<16x32xf32>
    %332 = vector.broadcast %313 : vector<1x32xf32> to vector<16x32xf32>
    %333 = arith.mulf %331, %332 : vector<16x32xf32>
    %334 = vector.broadcast %315 : vector<1x32xf32> to vector<16x32xf32>
    %335 = arith.addf %333, %334 : vector<16x32xf32>
    %c0_153 = arith.constant 0 : index
    %c0_154 = arith.constant 0 : index
    %c0_155 = arith.constant 0 : index
    %336 = vector.load %arg16[%c0_153, %c0_154, %c0_155] : memref<1x16x32xf32, #tpu.memory_space<vmem>>, vector<1x16x32xf32>
    %337 = vector.shape_cast %336 : vector<1x16x32xf32> to vector<16x32xf32>
    %338 = vector.shape_cast %335 : vector<16x32xf32> to vector<1x16x32xf32>
    tpu.vector_store %arg16[%c0_153, %c0_154, %c0_155], %338 {strides = array<i32>} : memref<1x16x32xf32, #tpu.memory_space<vmem>>, vector<1x16x32xf32>,
    return
  }
  func.func @transform_0(%arg0: i32) -> (i32, i32, i32) {
    %c0_i32 = arith.constant 0 : i32
    %c0_i32_0 = arith.constant 0 : i32
    %c0_i32_1 = arith.constant 0 : i32
    return %arg0, %c0_i32, %c0_i32_0 : i32, i32, i32
  }
  func.func @transform_1(%arg0: i32) -> (i32, i32) {
    %c0_i32 = arith.constant 0 : i32
    %c0_i32_0 = arith.constant 0 : i32
    %c0_i32_1 = arith.constant 0 : i32
    return %c0_i32, %c0_i32_0 : i32, i32
  }
  func.func @transform_2(%arg0: i32) -> (i32, i32) {
    %c0_i32 = arith.constant 0 : i32
    %c0_i32_0 = arith.constant 0 : i32
    %c0_i32_1 = arith.constant 0 : i32
    return %c0_i32, %c0_i32_0 : i32, i32
  }
  func.func @transform_3(%arg0: i32) -> (i32, i32, i32) {
    %c0_i32 = arith.constant 0 : i32
    %c0_i32_0 = arith.constant 0 : i32
    %c0_i32_1 = arith.constant 0 : i32
    %c0_i32_2 = arith.constant 0 : i32
    return %c0_i32, %c0_i32_0, %c0_i32_1 : i32, i32, i32
  }
  func.func @transform_4(%arg0: i32) -> (i32, i32, i32) {
    %c0_i32 = arith.constant 0 : i32
    %c0_i32_0 = arith.constant 0 : i32
    %c0_i32_1 = arith.constant 0 : i32
    %c0_i32_2 = arith.constant 0 : i32
    return %c0_i32, %c0_i32_0, %c0_i32_1 : i32, i32, i32
  }
  func.func @transform_5(%arg0: i32) -> (i32, i32, i32) {
    %c0_i32 = arith.constant 0 : i32
    %c0_i32_0 = arith.constant 0 : i32
    %c0_i32_1 = arith.constant 0 : i32
    %c0_i32_2 = arith.constant 0 : i32
    return %c0_i32, %c0_i32_0, %c0_i32_1 : i32, i32, i32
  }
  func.func @transform_6(%arg0: i32) -> (i32, i32, i32) {
    %c0_i32 = arith.constant 0 : i32
    %c0_i32_0 = arith.constant 0 : i32
    %c0_i32_1 = arith.constant 0 : i32
    %c0_i32_2 = arith.constant 0 : i32
    return %c0_i32, %c0_i32_0, %c0_i32_1 : i32, i32, i32
  }
  func.func @transform_7(%arg0: i32) -> (i32, i32, i32) {
    %c0_i32 = arith.constant 0 : i32
    %c0_i32_0 = arith.constant 0 : i32
    %c0_i32_1 = arith.constant 0 : i32
    %c0_i32_2 = arith.constant 0 : i32
    return %c0_i32, %c0_i32_0, %c0_i32_1 : i32, i32, i32
  }
  func.func @transform_8(%arg0: i32) -> (i32, i32, i32) {
    %c0_i32 = arith.constant 0 : i32
    %c0_i32_0 = arith.constant 0 : i32
    %c0_i32_1 = arith.constant 0 : i32
    %c0_i32_2 = arith.constant 0 : i32
    return %c0_i32, %c0_i32_0, %c0_i32_1 : i32, i32, i32
  }
  func.func @transform_9(%arg0: i32) -> (i32, i32, i32) {
    %c0_i32 = arith.constant 0 : i32
    %c0_i32_0 = arith.constant 0 : i32
    %c0_i32_1 = arith.constant 0 : i32
    %c0_i32_2 = arith.constant 0 : i32
    return %c0_i32, %c0_i32_0, %c0_i32_1 : i32, i32, i32
  }
  func.func @transform_10(%arg0: i32) -> (i32, i32, i32) {
    %c0_i32 = arith.constant 0 : i32
    %c0_i32_0 = arith.constant 0 : i32
    %c0_i32_1 = arith.constant 0 : i32
    %c0_i32_2 = arith.constant 0 : i32
    return %c0_i32, %c0_i32_0, %c0_i32_1 : i32, i32, i32
  }
  func.func @transform_11(%arg0: i32) -> (i32, i32, i32) {
    %c0_i32 = arith.constant 0 : i32
    %c0_i32_0 = arith.constant 0 : i32
    %c0_i32_1 = arith.constant 0 : i32
    %c0_i32_2 = arith.constant 0 : i32
    return %c0_i32, %c0_i32_0, %c0_i32_1 : i32, i32, i32
  }
  func.func @transform_12(%arg0: i32) -> (i32, i32, i32) {
    %c0_i32 = arith.constant 0 : i32
    %c0_i32_0 = arith.constant 0 : i32
    %c0_i32_1 = arith.constant 0 : i32
    %c0_i32_2 = arith.constant 0 : i32
    return %c0_i32, %c0_i32_0, %c0_i32_1 : i32, i32, i32
  }
  func.func @transform_13(%arg0: i32) -> (i32, i32, i32) {
    %c0_i32 = arith.constant 0 : i32
    %c0_i32_0 = arith.constant 0 : i32
    %c0_i32_1 = arith.constant 0 : i32
    %c0_i32_2 = arith.constant 0 : i32
    return %c0_i32, %c0_i32_0, %c0_i32_1 : i32, i32, i32
  }
  func.func @transform_14(%arg0: i32) -> (i32, i32, i32) {
    %c0_i32 = arith.constant 0 : i32
    %c0_i32_0 = arith.constant 0 : i32
    %c0_i32_1 = arith.constant 0 : i32
    %c0_i32_2 = arith.constant 0 : i32
    return %c0_i32, %c0_i32_0, %c0_i32_1 : i32, i32, i32
  }
  func.func @transform_15(%arg0: i32) -> (i32, i32, i32) {
    %c0_i32 = arith.constant 0 : i32
    %c0_i32_0 = arith.constant 0 : i32
    %c0_i32_1 = arith.constant 0 : i32
    return %arg0, %c0_i32, %c0_i32_0 : i32, i32, i32
  }
}

</mosaic_0001>

<bundles_post_ra>
// kernel: transformer_v1_forward.1
= control target key start
LH: loop header
LB: loop body
LE: loop exit
PB: predicated region body
PF: predicated region fallthrough
CT: control target
= control target key end

     0   :  { %20 = vsyncpa [#allocation3], 0  ;;  %s5789_s0 = inlined_call_operand.vmem [shape: f32[2,16,768], index: 0, kind: input, shape index: {}]   ;;  %s5790_s1 = inlined_call_operand.vmem [shape: bf16[768,32], index: 1, kind: input, shape index: {}]   ;;  %s5791_s2 = inlined_call_operand.vmem [shape: f32[1,32], index: 2, kind: input, shape index: {}]   ;;  %s5792_s3 = inlined_call_operand.vmem [shape: bf16[2,32,96], index: 3, kind: input, shape index: {}]   ;;  %s5793_s4 = inlined_call_operand.vmem [shape: f32[2,1,96], index: 4, kind: input, shape index: {}]   ;;  %s5794_s5 = inlined_call_operand.vmem [shape: f32[2,32,32], index: 5, kind: input, shape index: {}]   ;;  %s5795_s6 = inlined_call_operand.vmem [shape: f32[2,1,32], index: 6, kind: input, shape index: {}]   ;;  %s5796_s7 = inlined_call_operand.vmem [shape: f32[2,1,32], index: 7, kind: input, shape index: {}]   ;;  %s5797_s8 = inlined_call_operand.vmem [shape: f32[2,1,32], index: 8, kind: input, shape index: {}]   ;;  %s5798_s9 = inlined_call_operand.vmem [shape: bf16[2,32,64], index: 9, kind: input, shape index: {}]   ;;  %s5799_s10 = inlined_call_operand.vmem [shape: f32[2,1,64], index: 10, kind: input, shape index: {}]   ;;  %s5800_s11 = inlined_call_operand.vmem [shape: bf16[2,64,32], index: 11, kind: input, shape index: {}]   ;;  %s5801_s12 = inlined_call_operand.vmem [shape: f32[2,1,32], index: 12, kind: input, shape index: {}]   ;;  %s5802_s13 = inlined_call_operand.vmem [shape: f32[2,1,32], index: 13, kind: input, shape index: {}]   ;;  %s5803_s14 = inlined_call_operand.vmem [shape: f32[2,1,32], index: 14, kind: input, shape index: {}]   ;;  %s5804_s15 = inlined_call_operand.hbm [shape: f32[2,16,32], index: 15, kind: output, shape index: {}]  }
   0x1   :  { %22 = vsyncpa [#allocation3 + $0x1], 0  ;;  %s5141_s18 = smov 0   ;;  %s5143_s19 = smov 0  }
   0x2   :  { %s5145_s20 = smov 0   ;;  %s5147_s21 = smov 0  }
   0x3 LB: > { %5821 = sst [smem:[#allocation5_spill]] %s5031_s18  ;;  %s5162_s22 = sadd.s32 4294967295, %s5043_s21   ;;  %s5043_s21 = sphi %s5147_s21, %s5840_s21   ;;  %s5039_s20 = sphi %s5145_s20, %s5842_s20   ;;  %s5035_s19 = sphi %s5143_s19, %s5844_s19   ;;  %s5031_s18 = sphi %s5141_s18, %s5843_s18  }
   0x4   : > { %5822 = sst [smem:[#allocation6_spill]] %s5039_s20  ;;  %s4035_s23 = sadd.s32 4294967294, %s5043_s21  }
   0x5   : > { %s5166_s24 = sadd.s32 1, %s5043_s21   ;;  %s355_s25 = sadd.s32 1, %s5039_s20 }
   0x6   : > { %5823 = sst [smem:[#allocation7_spill]] %s5166_s24  ;;  %s352_s26 = ssub.s32 %s5043_s21, %s5166_s24 }
   0x7   : > { %p365_p0 = scmp.ne.s32.totalorder %s5039_s20, %s5035_s19  ;;  %p353_p1 = scmp.eq.s32.totalorder %s352_s26, 0 }
   0x8   : > { %p366_p2 = scmp.eq.s32.totalorder %s5162_s22, 1  ;;  %p371_p3 = scmp.ne.s32.totalorder %s5035_s19, %s5031_s18 }
   0x9   : > { %p372_p4 = scmp.eq.s32.totalorder %s4035_s23, 1  ;;  %p4038_p7 = scmp.ge.s32.totalorder %s5043_s21, 1 }
   0xa   : > { %s5177_s27 = scalar_select %p353_p1, %s5039_s20, %s355_s25  }
   0xb   : > { %p5179_p5 = por %p366_p2, %p365_p0  ;;  %p5183_p6 = por %p372_p4, %p371_p3 }
   0xc   : > { %5824 = sst [smem:[#allocation8_spill]] %s5177_s27  ;;  %p440_p8 = scmp.lt.s32.totalorder %s5043_s21, 3 }
   0xd   : > { %s5826_s29 = scalar_select %p5183_p6, 1, 0 }
   0xe   : > { %p441_p9 = pnand %p4038_p7, %p440_p8 }
   0xf   : > { %5827 = sst [smem:[#allocation9_spill]] %s5826_s29  ;;  %v4837_v0 = vld [vmem:[%s5790_s1 + $0x40] sm:$0xff] (!%p441_p9)   ;;  %v4841_v4 = vld [vmem:[%s5790_s1 + $0x48] sm:$0xff] (!%p441_p9)   ;;  %v4845_v8 = vld [vmem:[%s5790_s1 + $0x50] sm:$0xff] (!%p441_p9)   ;;  %p488_p10 = scmp.lt.s32.totalorder (!%p441_p9), %s5162_s22, 1  ;;  %vm5046_vm0 = vmmov (!%p441_p9), 0  }
  0x10   : > { %444 = sbr.rel (%p441_p9) target bundleno = 6398 (0x18fe), region = 80  ;;  %v4838_v1 = vld [vmem:[%s5790_s1] sm:$0xff] (!%p441_p9)   ;;  %4226 = vmatprep.subr.bf16.mxu0 (!%p441_p9), %v4837_v0  ;;  %v4842_v5 = vld [vmem:[%s5790_s1 + $0x8] sm:$0xff] (!%p441_p9)   ;;  %v4846_v9 = vld [vmem:[%s5790_s1 + $0x10] sm:$0xff] (!%p441_p9)   ;;  %vm1050_vm1 = vcmask (!%p441_p9), 261120   ;;  %vm1107_vm2 = vcmask (!%p441_p9), 64512  }
  0x11   : > { %v4839_v2 = vld [vmem:[%s5790_s1 + $0xc0] sm:$0xff] (!%p441_p9)   ;;  %4227 = vmatpush3.bf16.msra.mxu0 (!%p441_p9), %v4838_v1  ;;  %v4843_v6 = vld [vmem:[%s5790_s1 + $0xc8] sm:$0xff] (!%p441_p9)   ;;  %v4847_v10 = vld [vmem:[%s5790_s1 + $0xd0] sm:$0xff] (!%p441_p9)   ;;  %s5817_s27 = smov (!%p441_p9), 112   ;;  %s5048_s24 = smov (!%p441_p9), 96   ;;  %vm1193_vm4 = vcmask (!%p441_p9), 130048  }
  0x12   : > { %v4840_v3 = vld [vmem:[%s5790_s1 + $0x80] sm:$0xff] (!%p441_p9)   ;;  %4248 = vmatprep.subr.bf16.mxu1 (!%p441_p9), %v4839_v2  ;;  %4228 = vmatprep.subr.bf16.mxu0 (!%p441_p9), %v4841_v4  ;;  %v4844_v7 = vld [vmem:[%s5790_s1 + $0x88] sm:$0xff] (!%p441_p9)   ;;  %v4848_v11 = vld [vmem:[%s5790_s1 + $0x90] sm:$0xff] (!%p441_p9)   ;;  %s5049_s29 = smov (!%p441_p9), 80   ;;  %s5819_s30 = smov (!%p441_p9), 120   ;;  %vm2397_vm5 = vcmask (!%p441_p9), 523264  }
  0x13   : > { %4249 = vmatpush3.bf16.msra.mxu1 (!%p441_p9), %v4840_v3  ;;  %v4849_v12 = vld [vmem:[%s5790_s1 + $0x58] sm:$0xff] (!%p441_p9)   ;;  %v4853_v16 = vld [vmem:[%s5790_s1 + $0x60] sm:$0xff] (!%p441_p9)   ;;  %v4857_v20 = vld [vmem:[%s5790_s1 + $0x68] sm:$0xff] (!%p441_p9)   ;;  %v5045_v3 = vmov (!%p441_p9), 0.0   ;;  %s5811_s23 = smov (!%p441_p9), 48   ;;  %s5813_s25 = smov (!%p441_p9), 104  }
  0x14   : > { %4250 = vmatprep.subr.bf16.mxu1 (!%p441_p9), %v4843_v6  ;;  %v4850_v13 = vld [vmem:[%s5790_s1 + $0x18] sm:$0xff] (!%p441_p9)   ;;  %v4854_v17 = vld [vmem:[%s5790_s1 + $0x20] sm:$0xff] (!%p441_p9)   ;;  %v4858_v21 = vld [vmem:[%s5790_s1 + $0x28] sm:$0xff] (!%p441_p9)   ;;  %s5815_s26 = smov (!%p441_p9), 72   ;;  %s5812_s20 = smov (!%p441_p9), 56  }
  0x15   : > { %4229 = vmatpush3.bf16.msra.mxu0 (!%p441_p9), %v4842_v5  ;;  %v4851_v14 = vld [vmem:[%s5790_s1 + $0xd8] sm:$0xff] (!%p441_p9)   ;;  %v4855_v18 = vld [vmem:[%s5790_s1 + $0xe0] sm:$0xff] (!%p441_p9)   ;;  %v4859_v22 = vld [vmem:[%s5790_s1 + $0xe8] sm:$0xff] (!%p441_p9)  }
  0x16   : > { %4230 = vmatprep.subr.bf16.mxu0 (!%p441_p9), %v4845_v8  ;;  %v4852_v15 = vld [vmem:[%s5790_s1 + $0x98] sm:$0xff] (!%p441_p9)   ;;  %v4856_v19 = vld [vmem:[%s5790_s1 + $0xa0] sm:$0xff] (!%p441_p9)   ;;  %v4860_v23 = vld [vmem:[%s5790_s1 + $0xa8] sm:$0xff] (!%p441_p9)  }
  0x17   : > { %4251 = vmatpush3.bf16.msra.mxu1 %v4844_v7  ;;  %s489_s17 = scalar_select %p488_p10, %s5162_s22, 1  ;;  %v4861_v24 = vld [vmem:[%s5790_s1 + $0x70] sm:$0xff]   ;;  %v4865_v28 = vld [vmem:[%s5790_s1 + $0x78] sm:$0xff]   ;;  %v4869_v38 = vld [vmem:[%s5790_s1 + $0x140] sm:$0xff]  }
  0x18   : > { %4252 = vmatprep.subr.bf16.mxu1 %v4847_v10  ;;  %v4862_v25 = vld [vmem:[%s5790_s1 + $0x30] sm:$0xff]   ;;  %v4866_v29 = vld [vmem:[%s5790_s1 + $0x38] sm:$0xff]   ;;  %v4870_v42 = vld [vmem:[%s5790_s1 + $0x100] sm:$0xff]  }
  0x19   : > { %4231 = vmatpush3.bf16.msra.mxu0 %v4846_v9  ;;  %s4702_s16 = smul.u32 96, %s489_s17  ;;  %v4863_v26 = vld [vmem:[%s5790_s1 + $0xf0] sm:$0xff]   ;;  %v4867_v30 = vld [vmem:[%s5790_s1 + $0xf8] sm:$0xff]   ;;  %v4871_v46 = vld [vmem:[%s5790_s1 + $0x148] sm:$0xff]   ;;  %s5816_s17 = smov 64  }
  0x1a   : > { %4232 = vmatprep.subr.bf16.mxu0 %v4849_v12  ;;  %v4864_v27 = vld [vmem:[%s5790_s1 + $0xb0] sm:$0xff]   ;;  %v4868_v34 = vld [vmem:[%s5790_s1 + $0xb8] sm:$0xff]   ;;  %v4872_v47 = vld [vmem:[%s5790_s1 + $0x108] sm:$0xff]  }
  0x1b   : > { %4253 = vmatpush3.bf16.msra.mxu1 %v4848_v11  ;;  %s5281_s18 = scalar_lea.vmem %s5789_s0, %s4702_s16  ;;  %v4873_v48 = vld [vmem:[%s5790_s1 + $0x150] sm:$0xff]   ;;  %v4875_v50 = vld [vmem:[%s5790_s1 + $0x158] sm:$0xff]   ;;  %v4877_v52 = vld [vmem:[%s5790_s1 + $0x160] sm:$0xff]   ;;  %s5810_s16 = smov 40  }
  0x1c   : > { %4254 = vmatprep.subr.bf16.mxu1 %v4851_v14  ;;  %v495_v31 = vld [vmem:[%s5281_s18 + $0x8] sm:$0xff]  ;;  %v501_v32 = vld [vmem:[%s5281_s18 + $0x38] sm:$0xff]  ;;  %v494_v35 = vld [vmem:[%s5281_s18] sm:$0xff] }
  0x1d   : > { %4233 = vmatpush3.bf16.msra.mxu0 %v4850_v13  ;;  %v507_v33 = vpack.c.bf16 %v501_v32, %v495_v31  ;;  %v500_v36 = vld [vmem:[%s5281_s18 + $0x30] sm:$0xff]  ;;  %v497_v39 = vld [vmem:[%s5281_s18 + $0x18] sm:$0xff]  ;;  %v503_v40 = vld [vmem:[%s5281_s18 + $0x48] sm:$0xff] }
  0x1e   : > { %4234 = vmatprep.subr.bf16.mxu0 %v4853_v16  ;;  %v506_v37 = vpack.c.bf16 %v500_v36, %v494_v35  ;;  %v509_v41 = vpack.c.bf16 %v503_v40, %v497_v39  ;;  %v496_v43 = vld [vmem:[%s5281_s18 + $0x10] sm:$0xff]  ;;  %v502_v44 = vld [vmem:[%s5281_s18 + $0x40] sm:$0xff]  ;;  %v4876_v51 = vld [vmem:[%s5790_s1 + $0x118] sm:$0xff]  }
  0x1f   : > { %4255 = vmatpush3.bf16.msra.mxu1 %v4852_v15  ;;  %935 = vmatprep.mubr.bf16.mxu0 %v507_v33  ;;  %v508_v45 = vpack.c.bf16 %v502_v44, %v496_v43  ;;  %v4874_v49 = vld [vmem:[%s5790_s1 + $0x110] sm:$0xff]   ;;  %v4878_v53 = vld [vmem:[%s5790_s1 + $0x120] sm:$0xff]   ;;  %v4879_v54 = vld [vmem:[%s5790_s1 + $0x168] sm:$0xff]  }
  0x20   : > { %4256 = vmatprep.subr.bf16.mxu1 %v4855_v18  ;;  %976 = vmatprep.mubr.bf16.mxu1 %v509_v41  ;;  %v499_v55 = vld [vmem:[%s5281_s18 + $0x28] sm:$0xff]  ;;  %v505_v57 = vld [vmem:[%s5281_s18 + $0x58] sm:$0xff]  ;;  %v4881_v58 = vld [vmem:[%s5790_s1 + $0x170] sm:$0xff]  }
  0x21   : > { %4235 = vmatpush3.bf16.msra.mxu0 %v4854_v17  ;;  %v4880_v56 = vld [vmem:[%s5790_s1 + $0x128] sm:$0xff]   ;;  %v511_v59 = vpack.c.bf16 %v505_v57, %v499_v55  ;;  %v4882_v60 = vld [vmem:[%s5790_s1 + $0x130] sm:$0xff]   ;;  %v4883_v61 = vld [vmem:[%s5790_s1 + $0x178] sm:$0xff]  }
  0x22   : > { %4236 = vmatprep.subr.bf16.mxu0 %v4857_v20  ;;  %v4884_v62 = vld [vmem:[%s5790_s1 + $0x138] sm:$0xff]   ;;  %v498_v63 = vld [vmem:[%s5281_s18 + $0x20] sm:$0xff]  ;;  %v504_v0 = vld [vmem:[%s5281_s18 + $0x50] sm:$0xff]  ;;  %s5054_s18 = smov 88  }
  0x23   : > { %4257 = vmatpush3.bf16.msra.mxu1 %v4856_v19  ;;  %v510_v1 = vpack.c.bf16 %v504_v0, %v498_v63  ;;  %v4885_v2 = vld [vmem:[%s5792_s3] sm:$0xff]   ;;  %v4886_v4 = vld [vmem:[%s5792_s3 + $0x8] sm:$0xff]   ;;  %vm5387_vm3 = vmpackc.low %vm1107_vm2, %vm1107_vm2 }
  0x24   : > { %4258 = vmatprep.subr.bf16.mxu1 %v4859_v22  ;;  %v4041_v6 = vld [vmem:[%s5791_s2] ss:$0 sm:$0xff] }
  0x25   : > { %4237 = vmatpush3.bf16.msra.mxu0 %v4858_v21  ;;  %v4090_v31 = vld [vmem:[%s5793_s4] ss:$0 sm:$0xff] }
  0x26   : > { %4238 = vmatprep.subr.bf16.mxu0 %v4861_v24 }
  0x27   : > { %4259 = vmatpush3.bf16.msra.mxu1 %v4860_v23 }
  0x28   : > { %4260 = vmatprep.subr.bf16.mxu1 %v4863_v26 }
  0x29   : > { %4239 = vmatpush3.bf16.msra.mxu0 %v4862_v25 }
  0x2a   : > { %4240 = vmatprep.subr.bf16.mxu0 %v4865_v28 }
  0x2b   : > { %4261 = vmatpush3.bf16.msra.mxu1 %v4864_v27 }
  0x2c   : > { %4262 = vmatprep.subr.bf16.mxu1 %v4867_v30 }
  0x2d   : > { %4241 = vmatpush3.bf16.msra.mxu0 %v4866_v29 }
  0x2e   : > { %4270 = vmatprep.subr.bf16.mxu0 %v4869_v38 }
  0x2f   : > { %4263 = vmatpush3.bf16.msra.mxu1 %v4868_v34 }
  0x30   : > { %936 = vmatmul.mubr.bf16.vlgmr.msra.gmra.mrb[0].mxu0 %v506_v37 }
  0x31   : > { %4271 = vmatpush3.bf16.msra.mxu0 %v4870_v42  ;;  %1017 = vmatprep.mubr.bf16.mxu0 %v511_v59 }
  0x32   : > { %977 = vmatmul.mubr.bf16.vlgmr.msra.gmra.mrb[0].mxu1 %v508_v45  ;;  %4272 = vmatprep.subr.bf16.mxu0 %v4871_v46 }
  0x35   : > { %4273 = vmatpush3.bf16.msra.mxu0 %v4872_v47 }
  0x36   : > { %4274 = vmatprep.subr.bf16.mxu0 %v4873_v48 }
  0x39   : > { %4275 = vmatpush3.bf16.msra.mxu0 %v4874_v49 }
  0x3a   : > { %4276 = vmatprep.subr.bf16.mxu0 %v4875_v50 }
  0x3d   : > { %4277 = vmatpush3.bf16.msra.mxu0 %v4876_v51 }
  0x3e   : > { %4278 = vmatprep.subr.bf16.mxu0 %v4877_v52 }
  0x41   : > { %4279 = vmatpush3.bf16.msra.mxu0 %v4878_v53 }
  0x42   : > { %4280 = vmatprep.subr.bf16.mxu0 %v4879_v54 }
  0x45   : > { %4281 = vmatpush3.bf16.msra.mxu0 %v4880_v56 }
  0x46   : > { %4282 = vmatprep.subr.bf16.mxu0 %v4881_v58 }
  0x49   : > { %4283 = vmatpush3.bf16.msra.mxu0 %v4882_v60 }
  0x4a   : > { %4284 = vmatprep.subr.bf16.mxu0 %v4883_v61 }
  0x4d   : > { %4285 = vmatpush3.bf16.msra.mxu0 %v4884_v62 }
  0x4e   : > { %4402 = vmatprep.subr.bf16.mxu0 %v5045_v3 }
  0x50   : > { %1018 = vmatmul.mubr.bf16.vlgmr.msra.gmra.mrb[4].mxu0 %v510_v1 }
  0x51   : > { %4403 = vmatpush3.bf16.msra.mxu0 %v4885_v2  ;;  %4406 = vmatprep.mubr.msk.bf16.mxu0 %vm5046_vm0, %v5045_v3 }
  0x52   : > { %4404 = vmatprep.subr.bf16.mxu0 %v5045_v3 }
  0x55   : > { %4405 = vmatpush3.bf16.msra.mxu0 %v4886_v4 }
 0x103   : > { %v4242_v5 = vpop.f32.mrb[0].mxu0 }
 0x104   : > { %v4243_v7 = vpop.f32.mrb[1].mxu0 }
 0x105   : > { %v4244_v8 = vadd.f32 %v4243_v7, %v4242_v5  ;;  %v4245_v9 = vpop.f32.mrb[2].mxu0  ;;  %v4264_v10 = vpop.f32.mrb[0].mxu1 }
 0x106   : > { %v4246_v11 = vpop.f32.mrb[3].mxu0  ;;  %v4265_v14 = vpop.f32.mrb[1].mxu1 }
 0x107   : > { %v938_v12 = vadd.f32 %v4244_v8, %v4041_v6  ;;  %v4247_v13 = vadd.f32 %v4246_v11, %v4245_v9  ;;  %v4266_v15 = vadd.f32 %v4265_v14, %v4264_v10  ;;  %v4267_v16 = vpop.f32.mrb[2].mxu1 }
 0x108   : > { %v4268_v18 = vpop.f32.mrb[3].mxu1 }
 0x109   : > { %v941_v17 = vadd.f32 %v4247_v13, %v4041_v6  ;;  %v979_v19 = vadd.f32 %v4266_v15, %v938_v12  ;;  %v4269_v20 = vadd.f32 %v4268_v18, %v4267_v16 }
 0x10b   : > { %v982_v21 = vadd.f32 %v4269_v20, %v941_v17 }
 0x123   : > { %v4286_v22 = vpop.f32.mrb[4].mxu0 }
 0x124   : > { %v4287_v23 = vpop.f32.mrb[5].mxu0 }
 0x125   : > { %v4288_v24 = vadd.f32 %v4287_v23, %v4286_v22  ;;  %v4289_v25 = vpop.f32.mrb[6].mxu0 }
 0x126   : > { %v4290_v26 = vpop.f32.mrb[7].mxu0 }
 0x127   : > { %v5365_v27 = vadd.f32 %v4288_v24, %v979_v19  ;;  %v4291_v28 = vadd.f32 %v4290_v26, %v4289_v25 }
 0x129   : > { %v5367_v29 = vadd.f32 %v4291_v28, %v982_v21 }
 0x12b   : > { %v1026_v30 = vpack.c.bf16 %v5367_v29, %v5365_v27 }
 0x12d   : > { %4407 = vmatmul.mubr.msk.bf16.vlgmr.msra.gmra.mrb[8].mxu0 %vm1050_vm1, %v1026_v30 }
 0x200   : > { %v1088_v32 = vpop.f32.mrb[8].mxu0 }
 0x201   : > { %v1089_v33 = vadd.f32 %v4090_v31, %v1088_v32  ;;  %v4408_v34 = vpop.f32.mrb[9].mxu0 }
 0x202   : > { %v1091_v35 = vpop.f32.mrb[10].mxu0 }
 0x203   : > { %v1092_v36 = vadd.f32 %v4090_v31, %v1091_v35  ;;  %v4409_v37 = vpop.f32.mrb[11].mxu0  ;;  %v1099_v38 = vmul.f32 0.35355338, %v1089_v33 }
 0x205   : > { %1665 = vrot.lane.b32.xlu1 %v1099_v38, %s5817_s27  ;;  %4414 = vmatprep.mubr.msk.f32.mxu1 %vm1107_vm2, %v1099_v38  ;;  %v5377_v39 = vpack.i.bf16 %v1092_v36, %v1089_v33  ;;  %v1100_v40 = vmul.f32 0.35355338, %v1092_v36 }
 0x207   : > { %4758 = vrot.lane.b32.xlu0 %v5377_v39, %s5048_s24 }
 0x209   : > { %1667 = vrot.lane.b32.xlu1 %v1100_v40, %s5817_s27 }
 0x20b   : > { %4763 = vrot.lane.b32.xlu0 %v5377_v39, %s5049_s29 }
 0x277   : > { %v1666_v41 = vpop.permute.xlu1 %1665 }
 0x278   : > { %4452 = vmatprep.mubr.msk.f32.mxu0 %vm1107_vm2, %v1666_v41 }
 0x279   : > { %v4759_v42 = vpop.permute.xlu0 %4758 }
 0x27a   : > { %v4761_v43 = vunpack.i.h.bf16 %v4759_v42  ;;  %v4760_v44 = vunpack.i.l.bf16 %v4759_v42 }
 0x27b   : > { %v1668_v51 = vpop.permute.xlu1 %1667 }
 0x27c   : > { %v4610_v46 = vpack.c.bf16 %v4761_v43, %v4760_v44 }
 0x27d   : > { %v4764_v47 = vpop.permute.xlu0 %4763 }
 0x27e   : > { %v4766_v48 = vunpack.i.h.bf16 %v4764_v47  ;;  %v4765_v49 = vunpack.i.l.bf16 %v4764_v47  ;;  %4612 = vmatprep.subr.msk.bf16.mxu1 %vm5387_vm3, %v4610_v46 }
 0x27f   : > { %4615 = vmatpush3.bf16.xpose.msk.msra.mxu1 %vm5387_vm3, %v4610_v46 }
 0x280   : > { %v4630_v50 = vpack.c.bf16 %v4766_v48, %v4765_v49 }
 0x282   : > { %4632 = vmatprep.subr.msk.bf16.mxu0 %vm5387_vm3, %v4630_v50 }
 0x283   : > { %4635 = vmatpush3.bf16.xpose.msk.msra.mxu0 %vm5387_vm3, %v4630_v50 }
 0x286   : > { %4415 = vmatmul.mubr.msk.f32.vlgmr.msra.gmra.mrb[4].mxu1 %vm1107_vm2, %v1100_v40 }
 0x28a   : > { %4453 = vmatmul.mubr.msk.f32.vlgmr.msra.gmra.mrb[12].mxu0 %vm1107_vm2, %v1668_v51 }
 0x359   : > { %v4416_v52 = vpop.f32.mrb[4].mxu1 }
 0x35a   : > { %v1184_v53 = vpop.f32.mrb[5].mxu1  ;;  %v1197_v54 = vsel %vm1193_vm4, %v4416_v52, -inf }
 0x35b   : > { %1198 = vmax.xlane.f32.xlu1 %v1197_v54  ;;  %v1194_v55 = vsel %vm1193_vm4, %v1184_v53, -inf }
 0x35c   : > { %1195 = vmax.xlane.f32.xlu0 %v1194_v55 }
 0x35d   : > { %v4454_v56 = vpop.f32.mrb[12].mxu0 }
 0x35e   : > { %v5403_v57 = vpop.f32.mrb[13].mxu0  ;;  %v1759_v58 = vsel %vm1193_vm4, %v4454_v56, -inf }
 0x35f   : > { %v1756_v19 = vsel %vm1193_vm4, %v5403_v57, -inf }
 0x36c   : > { %4768 = vrot.lane.b32.xlu1 %v5377_v39, %s5816_s17 }
 0x370   : > { %1303 = vrot.lane.b32.xlu1 %v1099_v38, %s5819_s30 }
 0x374   : > { %1305 = vrot.lane.b32.xlu1 %v1100_v40, %s5819_s30 }
 0x398   : > { %1760 = vmax.xlane.f32.xlu1 %v1759_v58 }
 0x3a9   : > { %4778 = vrot.lane.b32.xlu1 %v5377_v39, %s5811_s23 }
 0x3ad   : > { %1948 = vrot.lane.b32.xlu1 %v1099_v38, %s5813_s25 }
 0x3b1   : > { %1950 = vrot.lane.b32.xlu1 %v1100_v40, %s5813_s25  ;;  %s5830_s25 = smov 120  }
 0x3e8   : > { %v1199_v59 = vpop.xlane.xlu1 %1198 }
 0x3e9   : > { %v1201_v60 = vsub.f32 %v4416_v52, %v1199_v59  ;;  %v1196_v61 = vpop.xlane.xlu0 %1195 }
 0x3ea   : > { %v1200_v62 = vsub.f32 %v1184_v53, %v1196_v61 }
 0x3eb   : > { %v1204_v63 = vmul.f32 1.442695, %v1201_v60 }
 0x3ec   : > { %v1202_v0 = vmul.f32 1.442695, %v1200_v62  ;;  %v4769_v1 = vpop.permute.xlu1 %4768 }
 0x3ed   : > { %4901 = vpow2.f32 %v1204_v63  ;;  %v4771_v2 = vunpack.i.h.bf16 %v4769_v1  ;;  %v4770_v4 = vunpack.i.l.bf16 %v4769_v1 }
 0x3ee   : > { %4903 = vpow2.f32 %v1202_v0 }
 0x3ef   : > { %v4616_v5 = vpack.c.bf16 %v4771_v2, %v4770_v4 }
 0x3f0   : > { %v1304_v10 = vpop.permute.xlu1 %1303 }
 0x3f1   : > { %4617 = vmatprep.subr.bf16.mxu1 %v4616_v5 }
 0x3f2   : > { %4619 = vmatpush3.bf16.msra.mxu1 %v4616_v5 }
 0x3f4   : > { %v1306_v11 = vpop.permute.xlu1 %1305 }
 0x3f7   : > { %v4902_v6 = vpop.eup %4901 }
 0x3f8   : > { %v1209_v7 = vsel %vm1193_vm4, %v4902_v6, 0.0  ;;  %v4904_v8 = vpop.eup %4903 }
 0x3f9   : > { %1210 = vadd.xlane.f32.xlu0 %v1209_v7  ;;  %v1206_v9 = vsel %vm1193_vm4, %v4904_v8, 0.0 }
 0x3fd   : > { %1207 = vadd.xlane.f32.xlu0 %v1206_v9 }
 0x413   : > { %4773 = vrot.lane.b32.xlu0 %v5377_v39, %s5054_s18 }
 0x425   : > { %v1761_v12 = vpop.xlane.xlu1 %1760 }
 0x426   : > { %v1763_v13 = vsub.f32 %v4454_v56, %v1761_v12 }
 0x428   : > { %v1766_v14 = vmul.f32 1.442695, %v1763_v13 }
 0x429   : > { %v4779_v15 = vpop.permute.xlu1 %4778 }
 0x42a   : > { %4905 = vpow2.f32 %v1766_v14  ;;  %v4781_v16 = vunpack.i.h.bf16 %v4779_v15  ;;  %v4780_v17 = vunpack.i.l.bf16 %v4779_v15 }
 0x42c   : > { %v4636_v18 = vpack.c.bf16 %v4781_v16, %v4780_v17 }
 0x42d   : > { %v1949_v51 = vpop.permute.xlu1 %1948 }
 0x42e   : > { %4637 = vmatprep.subr.bf16.mxu0 %v4636_v18 }
 0x42f   : > { %4639 = vmatpush3.bf16.msra.mxu0 %v4636_v18 }
 0x431   : > { %v1951_v54 = vpop.permute.xlu1 %1950 }
 0x432   : > { %1757 = vmax.xlane.f32.xlu0 %v1756_v19 }
 0x434   : > { %v4906_v20 = vpop.eup %4905 }
 0x435   : > { %v1771_v21 = vsel %vm1193_vm4, %v4906_v20, 0.0 }
 0x436   : > { %1772 = vadd.xlane.f32.xlu0 %v1771_v21 }
 0x486   : > { %v1211_v22 = vpop.xlane.xlu0 %1210 }
 0x487   : > { %4907 = vrcp.f32 %v1211_v22 }
 0x48a   : > { %v1208_v23 = vpop.xlane.xlu0 %1207 }
 0x48b   : > { %4909 = vrcp.f32 %v1208_v23 }
 0x48e   : > { %v4774_v24 = vpop.permute.xlu0 %4773 }
 0x48f   : > { %v4776_v25 = vunpack.i.h.bf16 %v4774_v24  ;;  %v4775_v26 = vunpack.i.l.bf16 %v4774_v24 }
 0x491   : > { %v4620_v28 = vpack.c.bf16 %v4776_v25, %v4775_v26  ;;  %v4908_v30 = vpop.eup %4907 }
 0x492   : > { %v1215_v33 = vmul.f32 %v4908_v30, %v4902_v6 }
 0x493   : > { %4622 = vmatprep.subr.msk.bf16.mxu1 %vm5387_vm3, %v4620_v28 }
 0x495   : > { %v4910_v31 = vpop.eup %4909 }
 0x496   : > { %v1214_v32 = vmul.f32 %v4910_v31, %v4904_v8 }
 0x498   : > { %4421 = vmatprep.mubr.msk.f32.mxu1 %vm1193_vm4, %v1214_v32 }
 0x499   : > { %4422 = vmatmul.mubr.msk.f32.vlgmr.msra.gmra.mrb[6].mxu1 %vm1193_vm4, %v1215_v33  ;;  %v1096_v33 = vld [vmem:[%s5794_s5 + $0x8] sm:$0xff] }
 0x49a   : > { %4625 = vmatpush3.bf16.xpose.msk.msra.mxu1 %vm5387_vm3, %v4620_v28  ;;  %4428 = vmatprep.mubr.msk.f32.mxu1 %vm1107_vm2, %v1304_v10 }
 0x4a1   : > { %4429 = vmatmul.mubr.msk.f32.vlgmr.msra.gmra.mrb[8].mxu1 %vm1107_vm2, %v1306_v11 }
 0x4bf   : > { %v1758_v34 = vpop.xlane.xlu0 %1757 }
 0x4c0   : > { %v1762_v35 = vsub.f32 %v5403_v57, %v1758_v34  ;;  %v1095_v34 = vld [vmem:[%s5794_s5] sm:$0xff] }
 0x4c2   : > { %v1764_v36 = vmul.f32 1.442695, %v1762_v35 }
 0x4c3   : > { %v1773_v40 = vpop.xlane.xlu0 %1772 }
 0x4c4   : > { %4911 = vpow2.f32 %v1764_v36 }
 0x4c5   : > { %4913 = vrcp.f32 %v1773_v40 }
 0x4ce   : > { %v4912_v37 = vpop.eup %4911 }
 0x4cf   : > { %v1768_v38 = vsel %vm1193_vm4, %v4912_v37, 0.0  ;;  %v4914_v47 = vpop.eup %4913 }
 0x4d0   : > { %1769 = vadd.xlane.f32.xlu0 %v1768_v38  ;;  %v1777_v50 = vmul.f32 %v4914_v47, %v4906_v20  ;;  %v1097_v38 = vld [vmem:[%s5794_s5 + $0x10] sm:$0xff] }
 0x4e6   : > { %4783 = vrot.lane.b32.xlu0 %v5377_v39, %s5815_s26  ;;  %s5831_s26 = smov 112  }
 0x55d   : > { %v1770_v41 = vpop.xlane.xlu0 %1769 }
 0x55e   : > { %4915 = vrcp.f32 %v1770_v41 }
 0x561   : > { %v4784_v42 = vpop.permute.xlu0 %4783 }
 0x562   : > { %v4786_v43 = vunpack.i.h.bf16 %v4784_v42  ;;  %v4785_v44 = vunpack.i.l.bf16 %v4784_v42 }
 0x564   : > { %v4640_v46 = vpack.c.bf16 %v4786_v43, %v4785_v44 }
 0x566   : > { %4642 = vmatprep.subr.msk.bf16.mxu0 %vm5387_vm3, %v4640_v46 }
 0x568   : > { %v4916_v48 = vpop.eup %4915 }
 0x569   : > { %v1776_v49 = vmul.f32 %v4916_v48, %v4912_v37 }
 0x56b   : > { %4459 = vmatprep.mubr.msk.f32.mxu0 %vm1193_vm4, %v1776_v49  ;;  %v1098_v49 = vld [vmem:[%s5794_s5 + $0x18] sm:$0xff] }
 0x56c   : > { %v5436_v52 = vpop.f32.mrb[6].mxu1  ;;  %4460 = vmatmul.mubr.msk.f32.vlgmr.msra.gmra.mrb[14].mxu0 %vm1193_vm4, %v1777_v50 }
 0x56d   : > { %4645 = vmatpush3.bf16.xpose.msk.msra.mxu0 %vm5387_vm3, %v4640_v46  ;;  %v5441_v53 = vpop.f32.mrb[7].mxu1  ;;  %4471 = vmatprep.mubr.msk.f32.mxu0 %vm1107_vm2, %v1949_v51 }
 0x56e   : > { %4486 = vmatprep.subr.bf16.mxu0 %v5045_v3 }
 0x574   : > { %v4430_v55 = vpop.f32.mrb[8].mxu1  ;;  %4472 = vmatmul.mubr.msk.f32.vlgmr.msra.gmra.mrb[16].mxu0 %vm1107_vm2, %v1951_v54 }
 0x575   : > { %v1385_v56 = vpop.f32.mrb[9].mxu1  ;;  %v1397_v57 = vsel %vm1193_vm4, %v4430_v55, -inf  ;;  %4490 = vmatprep.mubr.msk.bf16.mxu0 %vm5046_vm0, %v5045_v3 }
 0x576   : > { %1398 = vmax.xlane.f32.xlu1 %v1397_v57  ;;  %v1394_v58 = vsel %vm1193_vm4, %v1385_v56, -inf }
 0x577   : > { %1395 = vmax.xlane.f32.xlu0 %v1394_v58 }
 0x587   : > { %4788 = vrot.lane.b32.xlu1 %v5377_v39, %s5812_s20  ;;  %s5835_s20 = smov 56  }
 0x58b   : > { %4793 = vrot.lane.b32.xlu1 %v5377_v39, %s5810_s16  ;;  %s5836_s16 = smov 48  }
 0x603   : > { %v1399_v59 = vpop.xlane.xlu1 %1398 }
 0x604   : > { %v1401_v60 = vsub.f32 %v4430_v55, %v1399_v59  ;;  %v1396_v61 = vpop.xlane.xlu0 %1395 }
 0x605   : > { %v1400_v62 = vsub.f32 %v1385_v56, %v1396_v61 }
 0x606   : > { %v1404_v63 = vmul.f32 1.442695, %v1401_v60 }
 0x607   : > { %v1402_v0 = vmul.f32 1.442695, %v1400_v62  ;;  %v4789_v1 = vpop.permute.xlu1 %4788 }
 0x608   : > { %v4791_v2 = vunpack.i.h.bf16 %v4789_v1  ;;  %v4790_v4 = vunpack.i.l.bf16 %v4789_v1 }
 0x609   : > { %4917 = vpow2.f32 %v1402_v0 }
 0x60a   : > { %v4626_v5 = vpack.c.bf16 %v4791_v2, %v4790_v4  ;;  %4919 = vpow2.f32 %v1404_v63 }
 0x60b   : > { %v4794_v40 = vpop.permute.xlu1 %4793 }
 0x60c   : > { %4627 = vmatprep.subr.bf16.mxu1 %v4626_v5  ;;  %v4796_v42 = vunpack.i.h.bf16 %v4794_v40  ;;  %v4795_v43 = vunpack.i.l.bf16 %v4794_v40 }
 0x60d   : > { %4629 = vmatpush3.bf16.msra.mxu1 %v4626_v5 }
 0x60e   : > { %4438 = vmatprep.subr.mxu1 %v1096_v33  ;;  %v4646_v44 = vpack.c.bf16 %v4796_v42, %v4795_v43  ;;  %v4133_v42 = vld [vmem:[%s5801_s12] ss:$0 sm:$0xff] }
 0x613   : > { %v4918_v6 = vpop.eup %4917 }
 0x614   : > { %v1406_v7 = vsel %vm1193_vm4, %v4918_v6, 0.0  ;;  %v4920_v8 = vpop.eup %4919 }
 0x615   : > { %1407 = vadd.xlane.f32.xlu0 %v1406_v7  ;;  %v1409_v39 = vsel %vm1193_vm4, %v4920_v8, 0.0 }
 0x619   : > { %1410 = vadd.xlane.f32.xlu0 %v1409_v39  ;;  %v4889_v39 = vld [vmem:[%s5800_s11] sm:$0xff]  }
 0x63f   : > { %v4461_v9 = vpop.f32.mrb[14].mxu0 }
 0x640   : > { %v1856_v10 = vpop.f32.mrb[15].mxu0 }
 0x647   : > { %v4473_v11 = vpop.f32.mrb[16].mxu0 }
 0x648   : > { %v2030_v12 = vpop.f32.mrb[17].mxu0  ;;  %v2042_v14 = vsel %vm1193_vm4, %v4473_v11, -inf }
 0x649   : > { %v2039_v13 = vsel %vm1193_vm4, %v2030_v12, -inf }
 0x64a   : > { %2040 = vmax.xlane.f32.xlu0 %v2039_v13 }
 0x64e   : > { %2043 = vmax.xlane.f32.xlu0 %v2042_v14 }
 0x6a2   : > { %v1408_v15 = vpop.xlane.xlu0 %1407 }
 0x6a3   : > { %4921 = vrcp.f32 %v1408_v15 }
 0x6a6   : > { %v1411_v16 = vpop.xlane.xlu0 %1410 }
 0x6a7   : > { %4923 = vrcp.f32 %v1411_v16 }
 0x6ad   : > { %v4922_v17 = vpop.eup %4921 }
 0x6ae   : > { %v1414_v18 = vmul.f32 %v4922_v17, %v4918_v6 }
 0x6b0   : > { %4435 = vmatprep.mubr.msk.f32.mxu1 %vm1193_vm4, %v1414_v18  ;;  %v4127_v18 = vld [vmem:[%s5796_s7] ss:$0 sm:$0xff] }
 0x6b1   : > { %v4924_v19 = vpop.eup %4923 }
 0x6b2   : > { %v1415_v20 = vmul.f32 %v4924_v19, %v4920_v8  ;;  %v4888_v8 = vld [vmem:[%s5798_s9 + $0x8] sm:$0xff]  }
 0x6b4   : > { %4436 = vmatmul.mubr.msk.f32.vlgmr.msra.gmra.mrb[10].mxu1 %vm1193_vm4, %v1415_v20 }
 0x6b5   : > { %4439 = vmatpush3.msra.mxu1 %v1096_v33 }
 0x6b6   : > { %4443 = vmatprep.subr.mxu1 %v1095_v34 }
 0x6d7   : > { %v2041_v21 = vpop.xlane.xlu0 %2040 }
 0x6d8   : > { %v2045_v22 = vsub.f32 %v2030_v12, %v2041_v21 }
 0x6da   : > { %v2047_v23 = vmul.f32 1.442695, %v2045_v22  ;;  %v4128_v22 = vld [vmem:[%s5797_s8] ss:$0 sm:$0xff] }
 0x6db   : > { %v2044_v24 = vpop.xlane.xlu0 %2043 }
 0x6dc   : > { %4925 = vpow2.f32 %v2047_v23  ;;  %v2046_v25 = vsub.f32 %v4473_v11, %v2044_v24 }
 0x6de   : > { %v2049_v26 = vmul.f32 1.442695, %v2046_v25 }
 0x6e0   : > { %4927 = vpow2.f32 %v2049_v26 }
 0x6e6   : > { %v4926_v28 = vpop.eup %4925 }
 0x6e7   : > { %v2051_v30 = vsel %vm1193_vm4, %v4926_v28, 0.0 }
 0x6e8   : > { %2052 = vadd.xlane.f32.xlu0 %v2051_v30  ;;  %v4892_v30 = vld [vmem:[%s5800_s11 + $0x18] sm:$0xff]  }
 0x6ea   : > { %v4928_v31 = vpop.eup %4927 }
 0x6eb   : > { %v2054_v32 = vsel %vm1193_vm4, %v4928_v31, 0.0 }
 0x6ec   : > { %2055 = vadd.xlane.f32.xlu0 %v2054_v32 }
 0x775   : > { %v2053_v35 = vpop.xlane.xlu0 %2052 }
 0x776   : > { %4929 = vrcp.f32 %v2053_v35 }
 0x779   : > { %v2056_v41 = vpop.xlane.xlu0 %2055 }
 0x77a   : > { %4931 = vrcp.f32 %v2056_v41 }
 0x780   : > { %v4930_v46 = vpop.eup %4929 }
 0x781   : > { %v2059_v48 = vmul.f32 %v4930_v46, %v4926_v28  ;;  %v4891_v28 = vld [vmem:[%s5800_s11 + $0x10] sm:$0xff]  }
 0x784   : > { %v4932_v47 = vpop.eup %4931 }
 0x785   : > { %v2060_v50 = vmul.f32 %v4932_v47, %v4928_v31  ;;  %v4129_v31 = vld [vmem:[%s5799_s10] ss:$0 sm:$0xff] }
 0x787   : > { %v4437_v36 = vpop.f32.mrb[10].mxu1 }
 0x788   : > { %v1494_v37 = vpop.f32.mrb[11].mxu1 }
 0x789   : > { %4440 = vmatprep.mubr.msk.f32.mxu1 %vm1107_vm2, %v1494_v37 }
 0x78a   : > { %4441 = vmatmul.mubr.msk.f32.vlgmr.msra.gmra.mrb[12].mxu1 %vm1107_vm2, %v4437_v36 }
 0x78b   : > { %4444 = vmatpush3.msra.mxu1 %v1095_v34  ;;  %4445 = vmatprep.mubr.msk.f32.mxu1 %vm1107_vm2, %v5441_v53  ;;  %v4126_v53 = vld [vmem:[%s5795_s6] ss:$0 sm:$0xff] }
 0x78c   : > { %4462 = vmatprep.subr.mxu1 %v1097_v38 }
 0x792   : > { %4446 = vmatmul.mubr.msk.f32.vlgmr.msra.gmra.mrb[12].mxu1 %vm1107_vm2, %v5436_v52 }
 0x793   : > { %4463 = vmatpush3.msra.mxu1 %v1097_v38  ;;  %4464 = vmatprep.mubr.msk.f32.mxu1 %vm1107_vm2, %v1856_v10 }
 0x794   : > { %4647 = vmatprep.subr.bf16.mxu1 %v4646_v44 }
 0x79a   : > { %4465 = vmatmul.mubr.msk.f32.vlgmr.msra.gmra.mrb[12].mxu1 %vm1107_vm2, %v4461_v9  ;;  %v4890_v9 = vld [vmem:[%s5800_s11 + $0x8] sm:$0xff]  }
 0x79b   : > { %4649 = vmatpush3.bf16.msra.mxu1 %v4646_v44  ;;  %4478 = vmatprep.mubr.msk.f32.mxu1 %vm1193_vm4, %v2059_v48 }
 0x79c   : > { %4481 = vmatprep.subr.mxu1 %v1098_v49 }
 0x79e   : > { %4479 = vmatmul.mubr.msk.f32.vlgmr.msra.gmra.mrb[14].mxu1 %vm1193_vm4, %v2060_v50 }
 0x79f   : > { %4482 = vmatpush3.msra.mxu1 %v1098_v49 }
 0x7a0   : > { %4494 = vmatprep.subr.bf16.mxu1 %v5045_v3 }
 0x871   : > { %v4480_v51 = vpop.f32.mrb[14].mxu1 }
 0x872   : > { %v2139_v52 = vpop.f32.mrb[15].mxu1 }
 0x873   : > { %4483 = vmatprep.mubr.msk.f32.mxu1 %vm1107_vm2, %v2139_v52 }
 0x874   : > { %4484 = vmatmul.mubr.msk.f32.vlgmr.msra.gmra.mrb[12].mxu1 %vm1107_vm2, %v4480_v51 }
 0x875   : > { %4502 = vmatprep.mubr.msk.bf16.mxu1 %vm5046_vm0, %v5045_v3  ;;  %4495 = vmatpush3.bf16.msra.mxu1 %v4889_v39  ;;  %v4139_v39 = vld [vmem:[%s5802_s13] ss:$0 sm:$0xff] }
 0x876   : > { %4496 = vmatprep.subr.bf16.mxu1 %v5045_v3 }
 0x879   : > { %4497 = vmatpush3.bf16.msra.mxu1 %v4890_v9 }
 0x87a   : > { %4498 = vmatprep.subr.bf16.mxu1 %v5045_v3 }
 0x87d   : > { %4499 = vmatpush3.bf16.msra.mxu1 %v4891_v28 }
 0x87e   : > { %4500 = vmatprep.subr.bf16.mxu1 %v5045_v3 }
 0x881   : > { %4501 = vmatpush3.bf16.msra.mxu1 %v4892_v30 }
 0x947   : > { %v4485_v54 = vpop.f32.mrb[12].mxu1 }
 0x948   : > { %v2239_v55 = vadd.f32 %v4485_v54, %v4126_v53  ;;  %v2220_v56 = vpop.f32.mrb[13].mxu1 }
 0x949   : > { %v2238_v57 = vadd.f32 %v4126_v53, %v2220_v56 }
 0x94a   : > { %v2241_v58 = vadd.f32 %v2239_v55, %v5367_v29 }
 0x94b   : > { %v2240_v59 = vadd.f32 %v2238_v57, %v5365_v27  ;;  %v4887_v27 = vld [vmem:[%s5798_s9] sm:$0xff]  }
 0x94c   : > { %v2247_v60 = vsel %vm1050_vm1, %v2241_v58, 0.0  ;;  %4487 = vmatpush3.bf16.msra.mxu0 %v4887_v27 }
 0x94d   : > { %2248 = vadd.xlane.f32.xlu1 %v2247_v60  ;;  %v2244_v61 = vsel %vm1050_vm1, %v2240_v59, 0.0  ;;  %4488 = vmatprep.subr.bf16.mxu0 %v5045_v3 }
 0x94e   : > { %2245 = vadd.xlane.f32.xlu0 %v2244_v61 }
 0x950   : > { %4489 = vmatpush3.bf16.msra.mxu0 %v4888_v8 }
 0x951   : > { %4506 = vmatprep.subr.bf16.mxu0 %v5045_v3 }
 0x9da   : > { %v2249_v62 = vpop.xlane.xlu1 %2248 }
 0x9db   : > { %v2252_v63 = vmul.f32 0.03125, %v2249_v62  ;;  %v2246_v0 = vpop.xlane.xlu0 %2245 }
 0x9dc   : > { %v2251_v1 = vmul.f32 0.03125, %v2246_v0  ;;  %v4893_v0 = vld [vmem:[%s5792_s3 + $0x10] sm:$0xff]  }
 0x9dd   : > { %v2254_v2 = vsub.f32 %v2241_v58, %v2252_v63 }
 0x9de   : > { %v2253_v4 = vsub.f32 %v2240_v59, %v2251_v1  ;;  %v4894_v1 = vld [vmem:[%s5792_s3 + $0x18] sm:$0xff]  }
 0x9df   : > { %v2256_v7 = vmul.f32 %v2254_v2, %v2254_v2 }
 0x9e0   : > { %v2255_v5 = vmul.f32 %v2253_v4, %v2253_v4 }
 0x9e1   : > { %v2260_v29 = vsel %vm1050_vm1, %v2256_v7, 0.0 }
 0x9e2   : > { %v2257_v6 = vsel %vm1050_vm1, %v2255_v5, 0.0 }
 0x9e3   : > { %2258 = vadd.xlane.f32.xlu0 %v2257_v6 }
 0x9e7   : > { %2261 = vadd.xlane.f32.xlu0 %v2260_v29 }
 0xa70   : > { %v2259_v10 = vpop.xlane.xlu0 %2258 }
 0xa71   : > { %v2263_v11 = vmul.f32 0.03125, %v2259_v10 }
 0xa73   : > { %v2265_v12 = vadd.f32 1e-05, %v2263_v11 }
 0xa74   : > { %v2262_v13 = vpop.xlane.xlu0 %2261 }
 0xa75   : > { %4933 = vrsqrt.f32 %v2265_v12  ;;  %v2264_v14 = vmul.f32 0.03125, %v2262_v13  ;;  %v4140_v12 = vld [vmem:[%s5803_s14] ss:$0 sm:$0xff] }
 0xa77   : > { %v2266_v15 = vadd.f32 1e-05, %v2264_v14 }
 0xa79   : > { %4935 = vrsqrt.f32 %v2266_v15 }
 0xa7f   : > { %v4934_v16 = vpop.eup %4933 }
 0xa80   : > { %v2269_v17 = vmul.f32 %v4934_v16, %v2253_v4 }
 0xa82   : > { %v2277_v20 = vmul.f32 %v4127_v18, %v2269_v17  ;;  %v4146_v17 = vld [vmem:[%s5793_s4 + $0x1] ss:$0 sm:$0xff] }
 0xa83   : > { %v4936_v19 = vpop.eup %4935 }
 0xa84   : > { %v2270_v21 = vmul.f32 %v4936_v19, %v2254_v2  ;;  %v2285_v24 = vadd.f32 %v4128_v22, %v2277_v20 }
 0xa86   : > { %v2278_v23 = vmul.f32 %v4127_v18, %v2270_v21 }
 0xa88   : > { %v2286_v25 = vadd.f32 %v4128_v22, %v2278_v23 }
 0xa8a   : > { %v2287_v26 = vpack.c.bf16 %v2286_v25, %v2285_v24 }
 0xa8c   : > { %4491 = vmatmul.mubr.msk.bf16.vlgmr.msra.gmra.mrb[20].mxu0 %vm1050_vm1, %v2287_v26 }
 0xa8d   : > { %4510 = vmatprep.mubr.msk.bf16.mxu0 %vm5046_vm0, %v5045_v3  ;;  %4507 = vmatpush3.bf16.msra.mxu0 %v4893_v0 }
 0xa8e   : > { %4508 = vmatprep.subr.bf16.mxu0 %v5045_v3 }
 0xa91   : > { %4509 = vmatpush3.bf16.msra.mxu0 %v4894_v1 }
 0xb5f   : > { %v2348_v32 = vpop.f32.mrb[20].mxu0 }
 0xb60   : > { %v2349_v33 = vadd.f32 %v4129_v31, %v2348_v32  ;;  %v4492_v34 = vpop.f32.mrb[21].mxu0 }
 0xb61   : > { %v2351_v35 = vpop.f32.mrb[22].mxu0 }
 0xb62   : > { %v2352_v36 = vadd.f32 %v4129_v31, %v2351_v35  ;;  %v4493_v37 = vpop.f32.mrb[23].mxu0  ;;  %v2355_v38 = vmax.f32 %v2349_v33, 0.0 }
 0xb64   : > { %v2356_v40 = vmax.f32 %v2352_v36, 0.0 }
 0xb66   : > { %v2357_v41 = vpack.c.bf16 %v2356_v40, %v2355_v38 }
 0xb68   : > { %4503 = vmatmul.mubr.msk.bf16.vlgmr.msra.gmra.mrb[16].mxu1 %vm2397_vm5, %v2357_v41 }
 0xc3b   : > { %v2435_v43 = vpop.f32.mrb[16].mxu1 }
 0xc3c   : > { %v2436_v44 = vadd.f32 %v4133_v42, %v2435_v43  ;;  %v4504_v46 = vpop.f32.mrb[17].mxu1 }
 0xc3d   : > { %v2438_v47 = vpop.f32.mrb[18].mxu1 }
 0xc3e   : > { %v2439_v48 = vadd.f32 %v4133_v42, %v2438_v47  ;;  %v4505_v49 = vpop.f32.mrb[19].mxu1  ;;  %v2442_v50 = vadd.f32 %v2436_v44, %v2285_v24 }
 0xc40   : > { %v2446_v51 = vsel %vm1050_vm1, %v2442_v50, 0.0  ;;  %v2443_v52 = vadd.f32 %v2439_v48, %v2286_v25 }
 0xc41   : > { %2447 = vadd.xlane.f32.xlu0 %v2446_v51 }
 0xc42   : > { %v2449_v53 = vsel %vm1050_vm1, %v2443_v52, 0.0 }
 0xc45   : > { %2450 = vadd.xlane.f32.xlu0 %v2449_v53 }
 0xcce   : > { %v2448_v54 = vpop.xlane.xlu0 %2447 }
 0xccf   : > { %v2452_v55 = vmul.f32 0.03125, %v2448_v54 }
 0xcd1   : > { %v2454_v56 = vsub.f32 %v2442_v50, %v2452_v55 }
 0xcd2   : > { %v2451_v57 = vpop.xlane.xlu0 %2450 }
 0xcd3   : > { %v2453_v58 = vmul.f32 0.03125, %v2451_v57  ;;  %v2456_v59 = vmul.f32 %v2454_v56, %v2454_v56 }
 0xcd5   : > { %v2455_v60 = vsub.f32 %v2443_v52, %v2453_v58  ;;  %v2458_v61 = vsel %vm1050_vm1, %v2456_v59, 0.0 }
 0xcd6   : > { %2459 = vadd.xlane.f32.xlu0 %v2458_v61 }
 0xcd7   : > { %v2457_v62 = vmul.f32 %v2455_v60, %v2455_v60 }
 0xcd9   : > { %v2461_v63 = vsel %vm1050_vm1, %v2457_v62, 0.0 }
 0xcda   : > { %2462 = vadd.xlane.f32.xlu0 %v2461_v63 }
 0xd63   : > { %v2460_v2 = vpop.xlane.xlu0 %2459 }
 0xd64   : > { %v2464_v4 = vmul.f32 0.03125, %v2460_v2 }
 0xd66   : > { %v2466_v5 = vadd.f32 1e-05, %v2464_v4 }
 0xd67   : > { %v2463_v6 = vpop.xlane.xlu0 %2462 }
 0xd68   : > { %4937 = vrsqrt.f32 %v2466_v5  ;;  %v2465_v7 = vmul.f32 0.03125, %v2463_v6 }
 0xd6a   : > { %v2467_v29 = vadd.f32 1e-05, %v2465_v7 }
 0xd6c   : > { %4939 = vrsqrt.f32 %v2467_v29 }
 0xd72   : > { %v4938_v27 = vpop.eup %4937 }
 0xd73   : > { %v2470_v8 = vmul.f32 %v4938_v27, %v2454_v56 }
 0xd75   : > { %v2478_v10 = vmul.f32 %v4139_v39, %v2470_v8 }
 0xd76   : > { %v4940_v9 = vpop.eup %4939 }
 0xd77   : > { %v2471_v11 = vmul.f32 %v4940_v9, %v2455_v60  ;;  %v5554_v14 = vadd.f32 %v4140_v12, %v2478_v10 }
 0xd79   : > { %v2479_v13 = vmul.f32 %v4139_v39, %v2471_v11 }
 0xd7b   : > { %v5556_v15 = vadd.f32 %v4140_v12, %v2479_v13 }
 0xd7d   : > { %v2488_v16 = vpack.c.bf16 %v5556_v15, %v5554_v14 }
 0xd7f   : > { %4511 = vmatmul.mubr.msk.bf16.vlgmr.msra.gmra.mrb[24].mxu0 %vm1050_vm1, %v2488_v16 }
 0xe52   : > { %v2551_v18 = vpop.f32.mrb[24].mxu0 }
 0xe53   : > { %v2552_v19 = vadd.f32 %v4146_v17, %v2551_v18  ;;  %v4512_v20 = vpop.f32.mrb[25].mxu0 }
 0xe54   : > { %v2554_v21 = vpop.f32.mrb[26].mxu0 }
 0xe55   : > { %v2555_v22 = vadd.f32 %v4146_v17, %v2554_v21  ;;  %v4513_v23 = vpop.f32.mrb[27].mxu0  ;;  %v5564_v24 = vmul.f32 0.35355338, %v2552_v19 }
 0xe57   : > { %4518 = vmatprep.mubr.msk.f32.mxu0 %vm1107_vm2, %v5564_v24  ;;  %v5568_v25 = vpack.i.bf16 %v2555_v22, %v2552_v19  ;;  %v5578_v26 = vmul.f32 0.35355338, %v2555_v22 }
 0xe59   : > { %4803 = vrot.lane.b32.xlu1 %v5568_v25, %s5054_s18  ;;  %4798 = vrot.lane.b32.xlu0 %v5568_v25, %s5048_s24  ;;  %s5832_s24 = smov 64   ;;  %s5834_s18 = smov 104  }
 0xe5d   : > { %4808 = vrot.lane.b32.xlu1 %v5568_v25, %s5049_s29  ;;  %2765 = vrot.lane.b32.xlu0 %v5564_v24, %s5830_s25  ;;  %s5833_s29 = smov 72  }
 0xe61   : > { %3129 = vrot.lane.b32.xlu1 %v5578_v26, %s5831_s26  ;;  %2767 = vrot.lane.b32.xlu0 %v5578_v26, %s5830_s25  ;;  %s4225_s25 = sshll.u32 %s5162_s22, 8 }
 0xe65   : > { %3127 = vrot.lane.b32.xlu0 %v5564_v24, %s5831_s26 }
 0xecb   : > { %v4804_v28 = vpop.permute.xlu1 %4803  ;;  %v4799_v30 = vpop.permute.xlu0 %4798 }
 0xecc   : > { %v4806_v31 = vunpack.i.h.bf16 %v4804_v28  ;;  %v4805_v32 = vunpack.i.l.bf16 %v4804_v28  ;;  %v4801_v33 = vunpack.i.h.bf16 %v4799_v30  ;;  %v4800_v34 = vunpack.i.l.bf16 %v4799_v30 }
 0xece   : > { %v4650_v35 = vpack.c.bf16 %v4801_v33, %v4800_v34  ;;  %v4660_v36 = vpack.c.bf16 %v4806_v31, %v4805_v32 }
 0xecf   : > { %v4809_v37 = vpop.permute.xlu1 %4808  ;;  %v2766_v41 = vpop.permute.xlu0 %2765 }
 0xed0   : > { %4652 = vmatprep.subr.msk.bf16.mxu0 %vm5387_vm3, %v4650_v35  ;;  %v4811_v38 = vunpack.i.h.bf16 %v4809_v37  ;;  %v4810_v40 = vunpack.i.l.bf16 %v4809_v37 }
 0xed1   : > { %4655 = vmatpush3.bf16.xpose.msk.msra.mxu0 %vm5387_vm3, %v4650_v35 }
 0xed2   : > { %4662 = vmatprep.subr.msk.bf16.mxu0 %vm5387_vm3, %v4660_v36  ;;  %v4670_v42 = vpack.c.bf16 %v4811_v38, %v4810_v40 }
 0xed3   : > { %v2768_v43 = vpop.permute.xlu0 %2767  ;;  %v3130_v46 = vpop.permute.xlu1 %3129 }
 0xed7   : > { %v3128_v44 = vpop.permute.xlu0 %3127 }
 0xed8   : > { %4519 = vmatmul.mubr.msk.f32.vlgmr.msra.gmra.mrb[18].mxu0 %vm1107_vm2, %v5578_v26 }
 0xed9   : > { %4665 = vmatpush3.bf16.xpose.msk.msra.mxu0 %vm5387_vm3, %v4660_v36  ;;  %4532 = vmatprep.mubr.msk.f32.mxu0 %vm1107_vm2, %v2766_v41 }
 0xeda   : > { %4672 = vmatprep.subr.msk.bf16.mxu0 %vm5387_vm3, %v4670_v42 }
 0xee0   : > { %4533 = vmatmul.mubr.msk.f32.vlgmr.msra.gmra.mrb[28].mxu0 %vm1107_vm2, %v2768_v43 }
 0xee1   : > { %4675 = vmatpush3.bf16.xpose.msk.msra.mxu0 %vm5387_vm3, %v4670_v42  ;;  %4556 = vmatprep.mubr.msk.f32.mxu0 %vm1107_vm2, %v3128_v44 }
 0xee8   : > { %4557 = vmatmul.mubr.msk.f32.vlgmr.msra.gmra.mrb[30].mxu0 %vm1107_vm2, %v3130_v46 }
 0xfab   : > { %v4520_v47 = vpop.f32.mrb[18].mxu0 }
 0xfac   : > { %v2647_v48 = vpop.f32.mrb[19].mxu0  ;;  %v2659_v49 = vsel %vm1193_vm4, %v4520_v47, -inf }
 0xfad   : > { %2660 = vmax.xlane.f32.xlu1 %v2659_v49  ;;  %v2656_v50 = vsel %vm1193_vm4, %v2647_v48, -inf }
 0xfae   : > { %2657 = vmax.xlane.f32.xlu0 %v2656_v50 }
 0xfb3   : > { %v4534_v51 = vpop.f32.mrb[28].mxu0 }
 0xfb4   : > { %v2847_v52 = vpop.f32.mrb[29].mxu0  ;;  %v2859_v54 = vsel %vm1193_vm4, %v4534_v51, -inf }
 0xfb5   : > { %v2856_v53 = vsel %vm1193_vm4, %v2847_v52, -inf }
 0xfb6   : > { %2857 = vmax.xlane.f32.xlu0 %v2856_v53 }
 0xfba   : > { %2860 = vmax.xlane.f32.xlu0 %v2859_v54 }
 0xfbb   : > { %v5608_v55 = vpop.f32.mrb[30].mxu0 }
 0xfbc   : > { %v5610_v56 = vpop.f32.mrb[31].mxu0  ;;  %v3221_v12 = vsel %vm1193_vm4, %v5608_v55, -inf }
 0xfbd   : > { %v3218_v11 = vsel %vm1193_vm4, %v5610_v56, -inf }
0x103a   : > { %v2661_v57 = vpop.xlane.xlu1 %2660 }
0x103b   : > { %v2663_v58 = vsub.f32 %v4520_v47, %v2661_v57  ;;  %v2658_v59 = vpop.xlane.xlu0 %2657 }
0x103c   : > { %v2662_v60 = vsub.f32 %v2647_v48, %v2658_v59 }
0x103d   : > { %v2666_v61 = vmul.f32 1.442695, %v2663_v58 }
0x103e   : > { %v2664_v62 = vmul.f32 1.442695, %v2662_v60 }
0x103f   : > { %4941 = vpow2.f32 %v2666_v61 }
0x1040   : > { %4943 = vpow2.f32 %v2664_v62 }
0x1043   : > { %v2858_v63 = vpop.xlane.xlu0 %2857 }
0x1044   : > { %v2862_v0 = vsub.f32 %v2847_v52, %v2858_v63 }
0x1046   : > { %v2864_v1 = vmul.f32 1.442695, %v2862_v0 }
0x1047   : > { %v2861_v2 = vpop.xlane.xlu0 %2860 }
0x1048   : > { %4945 = vpow2.f32 %v2864_v1  ;;  %v2863_v4 = vsub.f32 %v4534_v51, %v2861_v2 }
0x1049   : > { %v4942_v5 = vpop.eup %4941 }
0x104a   : > { %v4944_v6 = vpop.eup %4943  ;;  %v2866_v7 = vmul.f32 1.442695, %v2863_v4  ;;  %v2671_v29 = vsel %vm1193_vm4, %v4942_v5, 0.0 }
0x104b   : > { %2672 = vadd.xlane.f32.xlu0 %v2671_v29  ;;  %v2668_v27 = vsel %vm1193_vm4, %v4944_v6, 0.0 }
0x104c   : > { %4947 = vpow2.f32 %v2866_v7  ;;  %2669 = vadd.xlane.f32.xlu1 %v2668_v27 }
0x1052   : > { %v4946_v8 = vpop.eup %4945 }
0x1053   : > { %v2868_v39 = vsel %vm1193_vm4, %v4946_v8, 0.0 }
0x1054   : > { %2869 = vadd.xlane.f32.xlu1 %v2868_v39 }
0x1056   : > { %v4948_v9 = vpop.eup %4947 }
0x1057   : > { %v2871_v10 = vsel %vm1193_vm4, %v4948_v9, 0.0 }
0x1058   : > { %2872 = vadd.xlane.f32.xlu0 %v2871_v10 }
0x1065   : > { %4813 = vrot.lane.b32.xlu1 %v5568_v25, %s5832_s24  ;;  %s5837_s24 = smov 40  }
0x1069   : > { %4823 = vrot.lane.b32.xlu1 %v5568_v25, %s5833_s29 }
0x106d   : > { %3410 = vrot.lane.b32.xlu1 %v5564_v24, %s5834_s18 }
0x106e   : > { %4818 = vrot.lane.b32.xlu0 %v5568_v25, %s5835_s20  ;;  %s485_s20 = sand.u32 1, %s5035_s19  }
0x106f   : > { %s4039_s30 = sshll.u32 %s485_s20, 4  ;;  %s5748_s27 = scalar_lea.sflag [#allocation3], %s485_s20 }
0x1070   : > { %s487_s26 = scalar_lea.vmem [#allocation2], %s4039_s30  ;;  %s5058_s30 = smov [#allocation2]  }
0x1071   : > { %s4985_s17 = sshll.u32 %s5058_s30, 4  ;;  %s4986_s17 = int_to_ptr.vmem [resolvable:$false] %s4985_s17 }
0x1072   : > { %3412 = vrot.lane.b32.xlu0 %v5578_v26, %s5834_s18  ;;  %s4987_s23 = scalar_lea.vmem %s4986_s17, 512 }
0x1091   : > { %3219 = vmax.xlane.f32.xlu1 %v3218_v11  ;;  %3222 = vmax.xlane.f32.xlu0 %v3221_v12 }
0x10d8   : > { %v2673_v16 = vpop.xlane.xlu0 %2672 }
0x10d9   : > { %v2670_v13 = vpop.xlane.xlu1 %2669 }
0x10da   : > { %4949 = vrcp.f32 %v2670_v13 }
0x10db   : > { %4951 = vrcp.f32 %v2673_v16 }
0x10e1   : > { %v2870_v17 = vpop.xlane.xlu1 %2869 }
0x10e2   : > { %4953 = vrcp.f32 %v2870_v17 }
0x10e4   : > { %v4950_v18 = vpop.eup %4949 }
0x10e5   : > { %v4814_v19 = vpop.permute.xlu1 %4813  ;;  %v2873_v20 = vpop.xlane.xlu0 %2872  ;;  %v2676_v21 = vmul.f32 %v4950_v18, %v4944_v6 }
0x10e6   : > { %v4816_v22 = vunpack.i.h.bf16 %v4814_v19  ;;  %v4815_v23 = vunpack.i.l.bf16 %v4814_v19  ;;  %4955 = vrcp.f32 %v2873_v20  ;;  %v4952_v26 = vpop.eup %4951 }
0x10e7   : > { %4525 = vmatprep.mubr.msk.f32.mxu1 %vm1193_vm4, %v2676_v21  ;;  %v2677_v36 = vmul.f32 %v4952_v26, %v4942_v5 }
0x10e8   : > { %v4656_v24 = vpack.c.bf16 %v4816_v22, %v4815_v23 }
0x10e9   : > { %v4824_v28 = vpop.permute.xlu1 %4823  ;;  %v4819_v30 = vpop.permute.xlu0 %4818 }
0x10ea   : > { %v4826_v31 = vunpack.i.h.bf16 %v4824_v28  ;;  %v4825_v32 = vunpack.i.l.bf16 %v4824_v28  ;;  %v4821_v33 = vunpack.i.h.bf16 %v4819_v30  ;;  %v4820_v34 = vunpack.i.l.bf16 %v4819_v30  ;;  %4657 = vmatprep.subr.bf16.mxu1 %v4656_v24 }
0x10eb   : > { %4659 = vmatpush3.bf16.msra.mxu1 %v4656_v24 }
0x10ec   : > { %v4954_v35 = vpop.eup %4953  ;;  %v4680_v37 = vpack.c.bf16 %v4826_v31, %v4825_v32  ;;  %v4666_v38 = vpack.c.bf16 %v4821_v33, %v4820_v34  ;;  %v4153_v33 = vld [vmem:[%s5794_s5 + $0x38] sm:$0xff] }
0x10ed   : > { %v3411_v40 = vpop.permute.xlu1 %3410  ;;  %v2876_v41 = vmul.f32 %v4954_v35, %v4946_v8  ;;  %v3413_v44 = vpop.permute.xlu0 %3412 }
0x10ee   : > { %4526 = vmatmul.mubr.msk.f32.vlgmr.msra.gmra.mrb[20].mxu1 %vm1193_vm4, %v2677_v36  ;;  %4667 = vmatprep.subr.bf16.mxu1 %v4666_v38 }
0x10ef   : > { %4682 = vmatprep.subr.msk.bf16.mxu0 %vm5387_vm3, %v4680_v37  ;;  %4575 = vmatprep.mubr.msk.f32.mxu0 %vm1107_vm2, %v3411_v40  ;;  %v4187_v40 = vld [vmem:[%s5795_s6 + $0x1] ss:$0 sm:$0xff] }
0x10f0   : > { %v4956_v42 = vpop.eup %4955  ;;  %4669 = vmatpush3.bf16.msra.mxu1 %v4666_v38  ;;  %4539 = vmatprep.mubr.msk.f32.mxu1 %vm1193_vm4, %v2876_v41 }
0x10f1   : > { %v2877_v43 = vmul.f32 %v4956_v42, %v4948_v9  ;;  %4685 = vmatpush3.bf16.xpose.msk.msra.mxu0 %vm5387_vm3, %v4680_v37  ;;  %v4152_v9 = vld [vmem:[%s5794_s5 + $0x30] sm:$0xff] }
0x10f2   : > { %4590 = vmatprep.subr.bf16.mxu0 %v5045_v3 }
0x10f3   : > { %4540 = vmatmul.mubr.msk.f32.vlgmr.msra.gmra.mrb[22].mxu1 %vm1193_vm4, %v2877_v43 }
0x10f8   : > { %4576 = vmatmul.mubr.msk.f32.vlgmr.msra.gmra.mrb[32].mxu0 %vm1107_vm2, %v3413_v44 }
0x10f9   : > { %4594 = vmatprep.mubr.msk.bf16.mxu0 %vm5046_vm0, %v5045_v3 }
0x111e   : > { %v3220_v46 = vpop.xlane.xlu1 %3219  ;;  %v3223_v47 = vpop.xlane.xlu0 %3222 }
0x111f   : > { %v3224_v48 = vsub.f32 %v5610_v56, %v3220_v46  ;;  %v3225_v49 = vsub.f32 %v5608_v55, %v3223_v47  ;;  %v4151_v56 = vld [vmem:[%s5794_s5 + $0x28] sm:$0xff]  ;;  %v4150_v55 = vld [vmem:[%s5794_s5 + $0x20] sm:$0xff] }
0x1120   : > { %4542 = vmatprep.subr.mxu1 %v4151_v56 }
0x1121   : > { %v3226_v50 = vmul.f32 1.442695, %v3224_v48  ;;  %v3228_v51 = vmul.f32 1.442695, %v3225_v49  ;;  %4543 = vmatpush3.msra.mxu1 %v4151_v56 }
0x1122   : > { %4547 = vmatprep.subr.mxu1 %v4150_v55 }
0x1123   : > { %4957 = vpow2.f32 %v3226_v50 }
0x1124   : > { %4959 = vpow2.f32 %v3228_v51 }
0x112d   : > { %v4958_v45 = vpop.eup %4957 }
0x112e   : > { %v4960_v52 = vpop.eup %4959  ;;  %v3230_v53 = vsel %vm1193_vm4, %v4958_v45, 0.0 }
0x112f   : > { %3231 = vadd.xlane.f32.xlu0 %v3230_v53  ;;  %v3233_v54 = vsel %vm1193_vm4, %v4960_v52, 0.0 }
0x1130   : > { %3234 = vadd.xlane.f32.xlu1 %v3233_v54 }
0x1145   : > { %4828 = vrot.lane.b32.xlu0 %v5568_v25, %s5836_s16  ;;  %s5743_s16 = scalar_lea.hbm %s5804_s15, %s4225_s25 }
0x11bc   : > { %v3232_v57 = vpop.xlane.xlu0 %3231 }
0x11bd   : > { %v3235_v61 = vpop.xlane.xlu1 %3234  ;;  %4961 = vrcp.f32 %v3232_v57 }
0x11be   : > { %4963 = vrcp.f32 %v3235_v61 }
0x11c0   : > { %v4829_v59 = vpop.permute.xlu0 %4828 }
0x11c1   : > { %v4527_v58 = vpop.f32.mrb[20].mxu1  ;;  %v4831_v62 = vunpack.i.h.bf16 %v4829_v59  ;;  %v4830_v63 = vunpack.i.l.bf16 %v4829_v59  ;;  %v4897_v59 = vld [vmem:[%s5800_s11 + $0x20] sm:$0xff]  }
0x11c2   : > { %v2756_v60 = vpop.f32.mrb[21].mxu1 }
0x11c3   : > { %v4676_v2 = vpack.c.bf16 %v4831_v62, %v4830_v63 }
0x11c6   : > { %v4541_v0 = vpop.f32.mrb[22].mxu1 }
0x11c7   : > { %v2956_v1 = vpop.f32.mrb[23].mxu1  ;;  %v4962_v7 = vpop.eup %4961 }
0x11c8   : > { %4544 = vmatprep.mubr.msk.f32.mxu1 %vm1107_vm2, %v2956_v1  ;;  %v4964_v29 = vpop.eup %4963  ;;  %v3238_v8 = vmul.f32 %v4962_v7, %v4958_v45 }
0x11c9   : > { %4545 = vmatmul.mubr.msk.f32.vlgmr.msra.gmra.mrb[24].mxu1 %vm1107_vm2, %v4541_v0  ;;  %v3239_v39 = vmul.f32 %v4964_v29, %v4960_v52 }
0x11ca   : > { %4548 = vmatpush3.msra.mxu1 %v4150_v55  ;;  %4549 = vmatprep.mubr.msk.f32.mxu1 %vm1107_vm2, %v2756_v60  ;;  %v4898_v60 = vld [vmem:[%s5800_s11 + $0x28] sm:$0xff]  }
0x11cb   : > { %v4577_v4 = vpop.f32.mrb[32].mxu0  ;;  %4677 = vmatprep.subr.bf16.mxu1 %v4676_v2 }
0x11cc   : > { %v3492_v5 = vpop.f32.mrb[33].mxu0  ;;  %v3504_v27 = vsel %vm1193_vm4, %v4577_v4, -inf }
0x11cd   : > { %v3501_v6 = vsel %vm1193_vm4, %v3492_v5, -inf }
0x11ce   : > { %3502 = vmax.xlane.f32.xlu1 %v3501_v6  ;;  %v4190_v6 = vld [vmem:[%s5796_s7 + $0x1] ss:$0 sm:$0xff] }
0x11d1   : > { %4550 = vmatmul.mubr.msk.f32.vlgmr.msra.gmra.mrb[24].mxu1 %vm1107_vm2, %v4527_v58  ;;  %v4896_v58 = vld [vmem:[%s5798_s9 + $0x18] sm:$0xff]  }
0x11d2   : > { %3505 = vmax.xlane.f32.xlu1 %v3504_v27  ;;  %4679 = vmatpush3.bf16.msra.mxu1 %v4676_v2 }
0x11d3   : > { %4563 = vmatprep.mubr.msk.f32.mxu1 %vm1193_vm4, %v3238_v8  ;;  %4566 = vmatprep.subr.mxu1 %v4152_v9  ;;  %v4191_v8 = vld [vmem:[%s5797_s8 + $0x1] ss:$0 sm:$0xff] }
0x11d5   : > { %4564 = vmatmul.mubr.msk.f32.vlgmr.msra.gmra.mrb[26].mxu1 %vm1193_vm4, %v3239_v39 }
0x11d6   : > { %4567 = vmatpush3.msra.mxu1 %v4152_v9 }
0x125b   : > { %v3503_v10 = vpop.xlane.xlu1 %3502 }
0x125c   : > { %v3507_v11 = vsub.f32 %v3492_v5, %v3503_v10 }
0x125e   : > { %v3509_v16 = vmul.f32 1.442695, %v3507_v11 }
0x125f   : > { %v3506_v12 = vpop.xlane.xlu1 %3505 }
0x1260   : > { %v3508_v13 = vsub.f32 %v4577_v4, %v3506_v12  ;;  %v4899_v12 = vld [vmem:[%s5800_s11 + $0x30] sm:$0xff]  }
0x1262   : > { %v3511_v17 = vmul.f32 1.442695, %v3508_v13  ;;  %v4900_v13 = vld [vmem:[%s5800_s11 + $0x38] sm:$0xff]  }
0x1264   : > { %4965 = vpow2.f32 %v3511_v17 }
0x1265   : > { %4967 = vpow2.f32 %v3509_v16  ;;  %v4197_v16 = vld [vmem:[%s5799_s10 + $0x1] ss:$0 sm:$0xff] }
0x126e   : > { %v4966_v18 = vpop.eup %4965 }
0x126f   : > { %v3516_v19 = vsel %vm1193_vm4, %v4966_v18, 0.0  ;;  %v4968_v20 = vpop.eup %4967 }
0x1270   : > { %3517 = vadd.xlane.f32.xlu1 %v3516_v19  ;;  %v3513_v21 = vsel %vm1193_vm4, %v4968_v20, 0.0 }
0x1274   : > { %3514 = vadd.xlane.f32.xlu1 %v3513_v21 }
0x1285   : > { %4833 = vrot.lane.b32.xlu1 %v5568_v25, %s5837_s24  ;;  %s3973_s24 = sshll.u32 %s487_s26, 4  ;;  %s5745_s24 = int_to_ptr.vmem [resolvable:$true] %s3973_s24 }
0x1286   : > { %s4981_s22 = scalar_lea.vmem %s5745_s24, 256  ;;  %p4988_p0 = scmp.lt.s32.totalorder %s5745_s24, %s4986_s17 }
0x1287   : > { %p4982_p11 = scmp.ne.s32.totalorder %s5745_s24, %s4981_s22  ;;  %p4989_p1 = scmp.lt.s32.totalorder %s4987_s23, %s4981_s22 }
0x1289   : > { %p4983_p12 = pnand %p4982_p11, %p5179_p5  ;;  %p4990_p2 = por %p4989_p1, %p4988_p0 }
0x128b   : > { %p4984_p13 = pneg %p4983_p12 }
0x128d   : > { %p4991_p3 = pnand %p4990_p2, %p4984_p13 }
0x12a8   : > { %v4565_v22 = vpop.f32.mrb[26].mxu1 }
0x12a9   : > { %v3318_v23 = vpop.f32.mrb[27].mxu1 }
0x12aa   : > { %4568 = vmatprep.mubr.msk.f32.mxu1 %vm1107_vm2, %v3318_v23 }
0x12ab   : > { %4569 = vmatmul.mubr.msk.f32.vlgmr.msra.gmra.mrb[24].mxu1 %vm1107_vm2, %v4565_v22 }
0x12fd   : > { %v3518_v24 = vpop.xlane.xlu1 %3517 }
0x12fe   : > { %4969 = vrcp.f32 %v3518_v24 }
0x1301   : > { %v3515_v26 = vpop.xlane.xlu1 %3514 }
0x1302   : > { %4971 = vrcp.f32 %v3515_v26 }
0x1305   : > { %v4834_v28 = vpop.permute.xlu1 %4833 }
0x1306   : > { %v4836_v30 = vunpack.i.h.bf16 %v4834_v28  ;;  %v4835_v31 = vunpack.i.l.bf16 %v4834_v28 }
0x1308   : > { %v4686_v32 = vpack.c.bf16 %v4836_v30, %v4835_v31  ;;  %v4970_v25 = vpop.eup %4969 }
0x1309   : > { %v3522_v36 = vmul.f32 %v4970_v25, %v4966_v18 }
0x130a   : > { %4687 = vmatprep.subr.bf16.mxu1 %v4686_v32 }
0x130b   : > { %4689 = vmatpush3.bf16.msra.mxu1 %v4686_v32 }
0x130c   : > { %v4972_v34 = vpop.eup %4971  ;;  %4585 = vmatprep.subr.mxu1 %v4153_v33 }
0x130d   : > { %v3521_v35 = vmul.f32 %v4972_v34, %v4968_v20 }
0x130f   : > { %4582 = vmatprep.mubr.msk.f32.mxu1 %vm1193_vm4, %v3521_v35 }
0x1310   : > { %4583 = vmatmul.mubr.msk.f32.vlgmr.msra.gmra.mrb[28].mxu1 %vm1193_vm4, %v3522_v36 }
0x1311   : > { %4586 = vmatpush3.msra.mxu1 %v4153_v33 }
0x1312   : > { %4598 = vmatprep.subr.bf16.mxu1 %v5045_v3 }
0x13e3   : > { %v4584_v37 = vpop.f32.mrb[28].mxu1 }
0x13e4   : > { %v3601_v38 = vpop.f32.mrb[29].mxu1 }
0x13e5   : > { %4587 = vmatprep.mubr.msk.f32.mxu1 %vm1107_vm2, %v3601_v38 }
0x13e6   : > { %4588 = vmatmul.mubr.msk.f32.vlgmr.msra.gmra.mrb[24].mxu1 %vm1107_vm2, %v4584_v37 }
0x13e7   : > { %4606 = vmatprep.mubr.msk.bf16.mxu1 %vm5046_vm0, %v5045_v3  ;;  %4599 = vmatpush3.bf16.msra.mxu1 %v4897_v59 }
0x13e8   : > { %4600 = vmatprep.subr.bf16.mxu1 %v5045_v3 }
0x13eb   : > { %4601 = vmatpush3.bf16.msra.mxu1 %v4898_v60 }
0x13ec   : > { %4602 = vmatprep.subr.bf16.mxu1 %v5045_v3 }
0x13ef   : > { %4603 = vmatpush3.bf16.msra.mxu1 %v4899_v12 }
0x13f0   : > { %4604 = vmatprep.subr.bf16.mxu1 %v5045_v3 }
0x13f3   : > { %4605 = vmatpush3.bf16.msra.mxu1 %v4900_v13 }
0x14b9   : > { %v4589_v41 = vpop.f32.mrb[24].mxu1 }
0x14ba   : > { %v3702_v42 = vadd.f32 %v4589_v41, %v4187_v40  ;;  %v3682_v43 = vpop.f32.mrb[25].mxu1 }
0x14bb   : > { %v3701_v44 = vadd.f32 %v4187_v40, %v3682_v43 }
0x14bc   : > { %v3704_v46 = vadd.f32 %v3702_v42, %v5556_v15 }
0x14bd   : > { %v3703_v47 = vadd.f32 %v3701_v44, %v5554_v14  ;;  %v4895_v14 = vld [vmem:[%s5798_s9 + $0x10] sm:$0xff]  }
0x14be   : > { %v3712_v48 = vsel %vm1050_vm1, %v3704_v46, 0.0  ;;  %4591 = vmatpush3.bf16.msra.mxu0 %v4895_v14 }
0x14bf   : > { %3713 = vadd.xlane.f32.xlu1 %v3712_v48  ;;  %v3709_v49 = vsel %vm1050_vm1, %v3703_v47, 0.0  ;;  %4592 = vmatprep.subr.bf16.mxu0 %v5045_v3  ;;  %v4210_v3 = vld [vmem:[%s5801_s12 + $0x1] ss:$0 sm:$0xff] }
0x14c0   : > { %3710 = vadd.xlane.f32.xlu0 %v3709_v49 }
0x14c2   : > { %4593 = vmatpush3.bf16.msra.mxu0 %v4896_v58 }
0x154c   : > { %v3714_v50 = vpop.xlane.xlu1 %3713 }
0x154d   : > { %v3716_v51 = vmul.f32 0.03125, %v3714_v50  ;;  %v3711_v45 = vpop.xlane.xlu0 %3710 }
0x154e   : > { %v3715_v52 = vmul.f32 0.03125, %v3711_v45 }
0x154f   : > { %v3718_v53 = vsub.f32 %v3704_v46, %v3716_v51 }
0x1550   : > { %v3717_v54 = vsub.f32 %v3703_v47, %v3715_v52 }
0x1551   : > { %v3720_v57 = vmul.f32 %v3718_v53, %v3718_v53 }
0x1552   : > { %v3719_v56 = vmul.f32 %v3717_v54, %v3717_v54 }
0x1553   : > { %v3724_v15 = vsel %vm1050_vm1, %v3720_v57, 0.0 }
0x1554   : > { %v3721_v55 = vsel %vm1050_vm1, %v3719_v56, 0.0 }
0x1555   : > { %3722 = vadd.xlane.f32.xlu0 %v3721_v55  ;;  %v4218_v55 = vld [vmem:[%s5802_s13 + $0x1] ss:$0 sm:$0xff] }
0x1559   : > { %3725 = vadd.xlane.f32.xlu0 %v3724_v15  ;;  %v4219_v15 = vld [vmem:[%s5803_s14 + $0x1] ss:$0 sm:$0xff] }
0x15e2   : > { %v3723_v61 = vpop.xlane.xlu0 %3722 }
0x15e3   : > { %v3727_v62 = vmul.f32 0.03125, %v3723_v61 }
0x15e5   : > { %v3729_v63 = vadd.f32 1e-05, %v3727_v62 }
0x15e6   : > { %v3726_v0 = vpop.xlane.xlu0 %3725 }
0x15e7   : > { %4973 = vrsqrt.f32 %v3729_v63  ;;  %v3728_v1 = vmul.f32 0.03125, %v3726_v0 }
0x15e9   : > { %v3730_v2 = vadd.f32 1e-05, %v3728_v1 }
0x15eb   : > { %4975 = vrsqrt.f32 %v3730_v2 }
0x15f1   : > { %v4974_v4 = vpop.eup %4973 }
0x15f2   : > { %v3733_v5 = vmul.f32 %v4974_v4, %v3717_v54 }
0x15f4   : > { %v3741_v29 = vmul.f32 %v4190_v6, %v3733_v5 }
0x15f5   : > { %v4976_v7 = vpop.eup %4975 }
0x15f6   : > { %v3734_v27 = vmul.f32 %v4976_v7, %v3718_v53  ;;  %v3749_v9 = vadd.f32 %v4191_v8, %v3741_v29 }
0x15f8   : > { %v3742_v39 = vmul.f32 %v4190_v6, %v3734_v27 }
0x15fa   : > { %v3750_v10 = vadd.f32 %v4191_v8, %v3742_v39 }
0x15fc   : > { %v3751_v11 = vpack.c.bf16 %v3750_v10, %v3749_v9 }
0x15fe   : > { %4595 = vmatmul.mubr.msk.bf16.vlgmr.msra.gmra.mrb[36].mxu0 %vm1050_vm1, %v3751_v11 }
0x16d1   : > { %v3814_v17 = vpop.f32.mrb[36].mxu0 }
0x16d2   : > { %v3815_v18 = vadd.f32 %v4197_v16, %v3814_v17  ;;  %v4596_v19 = vpop.f32.mrb[37].mxu0 }
0x16d3   : > { %v3817_v20 = vpop.f32.mrb[38].mxu0 }
0x16d4   : > { %v3818_v21 = vadd.f32 %v4197_v16, %v3817_v20  ;;  %v4597_v22 = vpop.f32.mrb[39].mxu0  ;;  %v3821_v23 = vmax.f32 %v3815_v18, 0.0 }
0x16d6   : > { %v3822_v24 = vmax.f32 %v3818_v21, 0.0 }
0x16d8   : > { %v3823_v26 = vpack.c.bf16 %v3822_v24, %v3821_v23 }
0x16da   : > { %4607 = vmatmul.mubr.msk.bf16.vlgmr.msra.gmra.mrb[32].mxu1 %vm2397_vm5, %v3823_v26 }
0x17ad   : > { %v3902_v28 = vpop.f32.mrb[32].mxu1 }
0x17ae   : > { %v3903_v30 = vadd.f32 %v4210_v3, %v3902_v28  ;;  %v4608_v31 = vpop.f32.mrb[33].mxu1 }
0x17af   : > { %v3905_v32 = vpop.f32.mrb[34].mxu1 }
0x17b0   : > { %v3906_v33 = vadd.f32 %v4210_v3, %v3905_v32  ;;  %v4609_v25 = vpop.f32.mrb[35].mxu1  ;;  %v3909_v34 = vadd.f32 %v3903_v30, %v3749_v9 }
0x17b2   : > { %v3915_v35 = vsel %vm1050_vm1, %v3909_v34, 0.0  ;;  %v3910_v36 = vadd.f32 %v3906_v33, %v3750_v10 }
0x17b3   : > { %3916 = vadd.xlane.f32.xlu0 %v3915_v35 }
0x17b4   : > { %v3918_v37 = vsel %vm1050_vm1, %v3910_v36, 0.0 }
0x17b7   : > { %3919 = vadd.xlane.f32.xlu0 %v3918_v37 }
0x1840   : > { %v3917_v38 = vpop.xlane.xlu0 %3916 }
0x1841   : > { %v3921_v40 = vmul.f32 0.03125, %v3917_v38 }
0x1843   : > { %v3923_v41 = vsub.f32 %v3909_v34, %v3921_v40 }
0x1844   : > { %v3920_v42 = vpop.xlane.xlu0 %3919 }
0x1845   : > { %v3922_v43 = vmul.f32 0.03125, %v3920_v42  ;;  %v3925_v44 = vmul.f32 %v3923_v41, %v3923_v41 }
0x1847   : > { %v3924_v46 = vsub.f32 %v3910_v36, %v3922_v43  ;;  %v3927_v47 = vsel %vm1050_vm1, %v3925_v44, 0.0 }
0x1848   : > { %3928 = vadd.xlane.f32.xlu0 %v3927_v47 }
0x1849   : > { %v3926_v48 = vmul.f32 %v3924_v46, %v3924_v46 }
0x184b   : > { %v3930_v49 = vsel %vm1050_vm1, %v3926_v48, 0.0 }
0x184c   : > { %3931 = vadd.xlane.f32.xlu1 %v3930_v49 }
0x18d5   : > { %v3929_v50 = vpop.xlane.xlu0 %3928 }
0x18d6   : > { %v3933_v51 = vmul.f32 0.03125, %v3929_v50 }
0x18d8   : > { %v3935_v45 = vadd.f32 1e-05, %v3933_v51 }
0x18d9   : > { %v3932_v52 = vpop.xlane.xlu1 %3931 }
0x18da   : > { %4977 = vrsqrt.f32 %v3935_v45  ;;  %v3934_v53 = vmul.f32 0.03125, %v3932_v52 }
0x18dc   : > { %v3936_v54 = vadd.f32 1e-05, %v3934_v53 }
0x18de   : > { %4979 = vrsqrt.f32 %v3936_v54 }
0x18e4   : > { %v4978_v56 = vpop.eup %4977 }
0x18e5   : > { %v3939_v57 = vmul.f32 %v4978_v56, %v3923_v41 }
0x18e7   : > { %v3947_v14 = vmul.f32 %v4218_v55, %v3939_v57 }
0x18e8   : > { %v4980_v58 = vpop.eup %4979 }
0x18e9   : > { %v3955_v59 = vadd.f32 %v4219_v15, %v3947_v14  ;;  %v3940_v60 = vmul.f32 %v4980_v58, %v3924_v46 }
0x18eb   : > { %v3948_v61 = vmul.f32 %v4218_v55, %v3940_v60  ;;  %3957 = vst.msk [vmem:[%s487_s26] sm:$0xff] %vm1050_vm1, %v3955_v59 }
0x18ed   : > { %v3956_v62 = vadd.f32 %v4219_v15, %v3948_v61 }
0x18ef   : > { %3958 = vst.msk [vmem:[%s487_s26 + $0x8] sm:$0xff] %vm1050_vm1, %v3956_v62 }
0x18f0   : > { %4994 = shalt.err (!%p4991_p3)
}
0x18f1   : > { %s4995_s20 = scalar_lea.hbm %s5743_s16, 256  ;;  %s4999_s29 = scalar_lea.hbm %s5804_s15, 512 }
0x18f2   : > { %p4996_p4 = scmp.ne.s32.totalorder %s5743_s16, %s4995_s20  ;;  %p5000_p9 = scmp.lt.u32.totalorder %s5743_s16, %s5804_s15 }
0x18f3   : > { %p5001_p10 = scmp.lt.u32.totalorder %s4999_s29, %s4995_s20  ;;  %p5003_p12 = scmp.lt.u32.totalorder %s4995_s20, %s5743_s16 }
0x18f4   : > { %p4997_p7 = pnand %p4996_p4, %p5179_p5 }
0x18f5   : > { %p5002_p11 = por %p5001_p10, %p5000_p9 }
0x18f6   : > { %p4998_p8 = pneg %p4997_p7 }
0x18f7   : > { %p5004_p13 = por %p5003_p12, %p5002_p11 }
0x18f9   : > { %p5005_p0 = pnand %p5004_p13, %p4998_p8 }
0x18fb   : > { %5008 = shalt.err (!%p5005_p0)
}
0x18fc   : > { %s5059_s22 = smov 128   ;;  %s5060_s17 = smov 8  }
0x18fd   : > { %4703 = dma.vmem_to_hbm [thread:$0]  (%p5179_p5), %s5745_s24, 256, %s5743_s16, %s5748_s27, %s5059_s22, %s5059_s22, %s5060_s17  }
0x18fe PF: > { %s5838_s23 = sld [smem:[#allocation5_spill]]  ;;  %p4709_p1 = scmp.ge.s32.totalorder %s5043_s21, 2 }
0x1900   : > { %p4706_p2 = pnand %p4709_p1, %p5183_p6 }
0x1904   : > { %s3988_s26 = sand.u32 1, %s5838_s23  }
0x1905   : > { %s3989_s20 = scalar_lea.sflag [#allocation3], %s3988_s26 }
0x1906   : > { %5026 = dma.done.wait (!%p4706_p2), %s3989_s20, 256  }
0x1907   : > { %5028 = vsyncadd (!%p4706_p2), %s3989_s20, 4294967040  ;;  %s5840_s21 = sld [smem:[#allocation7_spill]]  ;;  %s5841_s29 = sld [smem:[#allocation6_spill]] }
0x1908   : > { %s5842_s20 = sld [smem:[#allocation8_spill]]  ;;  %s5843_s18 = smov %s5035_s19 }
0x190d   : > { %p25_p3 = scmp.ge.s32.totalorder %s5840_s21, 4   ;;  %s5844_s19 = smov %s5841_s29 }
0x190f   :  { %27 = sbr.rel (!%p25_p3) target bundleno = 3 (0x3), region = 127 }
0x1916   :  { %3994 = vsyncpa [#allocation3], 1 }
0x1917   :  { %3996 = vsyncpa [#allocation3 + $0x1], 1 }

</bundles_post_ra>
